<compile_context>
chip_gen: v5e
topology: v5e:2x2
jax: 0.10.0
libtpu: 0.0.40
codegen_flags: <defaults>
</compile_context>

<pallas_src>
import functools

import jax
import jax.numpy as jnp
from jax.experimental import pallas as pl
from jax.experimental.pallas import tpu as pltpu

F32 = jnp.float32
BF16 = jnp.bfloat16
VMEM = pltpu.MemorySpace.VMEM

# ----------------------------- model config -----------------------------
NUM_NODE_TYPES = 8
NUM_EDGE_TYPES = 4
NODE_DIM = 32
EDGE_DIM = 32
TIME_DIM = 8
NUM_TIMESTEPS = 100
DIST_GAUSSIANS = 16
DIST_CUTOFF = 10.0


# ----------------------------- fused Pallas kernel -----------------------------
def _moldiff_kernel(
    # graph data
    x_node_ref, x_edge_ref, pos_ref, t_node_ref, t_edge_ref,
    src_col_ref, dst_col_ref, dst_row_ref,
    # embedders + time smearing
    w_nemb_ref, w_eemb_ref, toff_ref, tcoef_ref,
    # denoiser (split weights: y = x1@W1 + x2@W2 + ... instead of HBM concats)
    doff_ref, dcoef_ref,
    w_msg_n_ref, w_msg_e_ref, w_msg_g_ref, b_msg_ref,
    w_nup_h_ref, w_nup_a_ref, w_nup_t_ref, b_nup_ref,
    w_eem_e_ref, w_eem_g_ref, b_eem_ref,
    w_eup_e_ref, w_eup_s_ref, w_eup_d_ref, w_eup_t_ref, b_eup_ref,
    w_pos_e_ref, w_pos_t_ref, b_pos_ref,
    # decoders
    nd_w1_ref, nd_b1_ref, nd_g_ref, nd_be_ref, nd_w2_ref, nd_b2_ref,
    ed_w1_ref, ed_b1_ref, ed_g_ref, ed_be_ref, ed_w2_ref, ed_b2_ref,
    # outputs
    pred_node_ref, pred_pos_ref, pred_half_ref,
    *, n_half, inv_timesteps):
    n = pos_ref.shape[0]
    e = t_edge_ref.shape[0]

    def mm(a, b):
        # bf16 MXU operands, f32 accumulation
        return jnp.dot(a.astype(BF16), b.astype(BF16),
                       preferred_element_type=jnp.float32)

    # ---- type embedding + Gaussian time smearing (concat in-register) ----
    t_node = t_node_ref[...]                                   # (N,1)
    t_edge = t_edge_ref[...]                                   # (E,1)
    dtn = t_node - toff_ref[...]
    dte = t_edge - toff_ref[...]
    h_node = jnp.concatenate(
        [mm(x_node_ref[...], w_nemb_ref[...]),
         jnp.exp(tcoef_ref[...] * dtn * dtn)], axis=-1)        # (N, ND)
    h_edge = jnp.concatenate(
        [mm(x_edge_ref[...], w_eemb_ref[...]),
         jnp.exp(tcoef_ref[...] * dte * dte)], axis=-1)        # (E, ED)
    node_time = t_node * inv_timesteps                         # (N,1)
    edge_time = t_edge * inv_timesteps                         # (E,1)

    # ---- gather / scatter operators built on the VPU in VMEM (no HBM) ----
    iota_en = jax.lax.broadcasted_iota(jnp.int32, (e, n), 1)
    iota_ne = jax.lax.broadcasted_iota(jnp.int32, (n, e), 0)
    g_src = jnp.where(iota_en == src_col_ref[...], 1.0, 0.0)   # (E,N) gather src
    g_dst = jnp.where(iota_en == dst_col_ref[...], 1.0, 0.0)   # (E,N) gather dst
    s_dst = jnp.where(iota_ne == dst_row_ref[...], 1.0, 0.0)   # (N,E) scatter->dst

    # ---- relative positions / distance Gaussians (f32 for accuracy) ----
    pos = pos_ref[...]                                         # (N,3)
    rel = jnp.dot(g_src - g_dst, pos, preferred_element_type=jnp.float32)   # (E,3)
    dist = jnp.sqrt(jnp.sum(rel * rel, axis=-1, keepdims=True) + 1e-12)     # (E,1)
    dd = dist - doff_ref[...]
    dgauss = jnp.exp(dcoef_ref[...] * dd * dd)                 # (E, NG)

    # ---- node update ----
    h_src = mm(g_src, h_node)                                  # h_node[src]  (E,ND)
    msg = jnp.maximum(
        mm(h_src, w_msg_n_ref[...]) + mm(h_edge, w_msg_e_ref[...])
        + mm(dgauss, w_msg_g_ref[...]) + b_msg_ref[...], 0.0)  # (E,ND)
    agg = mm(s_dst, msg)                                       # scatter-add (N,ND)
    h_node = h_node + (mm(h_node, w_nup_h_ref[...]) + mm(agg, w_nup_a_ref[...])
                       + node_time * w_nup_t_ref[...] + b_nup_ref[...])

    # ---- edge update (uses updated node state) ----
    h_src = mm(g_src, h_node)
    h_dst = mm(g_dst, h_node)
    e_emb = (mm(h_edge, w_eem_e_ref[...]) + mm(dgauss, w_eem_g_ref[...])
             + b_eem_ref[...])
    h_edge = h_edge + (mm(e_emb, w_eup_e_ref[...]) + mm(h_src, w_eup_s_ref[...])
                       + mm(h_dst, w_eup_d_ref[...])
                       + edge_time * w_eup_t_ref[...] + b_eup_ref[...])

    # ---- equivariant position update ----
    s = (mm(h_edge, w_pos_e_ref[...]) + edge_time * w_pos_t_ref[...]
         + b_pos_ref[...])                                     # (E,1)
    delta = rel * s / (dist + 1.0)                             # (E,3)
    pred_pos_ref[...] = (pos + jnp.dot(s_dst, delta,
                                       preferred_element_type=jnp.float32)
                         ).astype(pred_pos_ref.dtype)

    # ---- MLP decoders (Linear -> LayerNorm -> ReLU -> Linear), fused epilogue ----
    def decode(x, w1, b1, gamma, beta, w2, b2):
        h = mm(x, w1) + b1
        mu = jnp.mean(h, axis=-1, keepdims=True)
        var = jnp.mean((h - mu) ** 2, axis=-1, keepdims=True)
        h = (h - mu) * jax.lax.rsqrt(var + 1e-5) * gamma + beta
        return mm(jnp.maximum(h, 0.0), w2) + b2

    pred_node_ref[...] = decode(
        h_node, nd_w1_ref[...], nd_b1_ref[...], nd_g_ref[...],
        nd_be_ref[...], nd_w2_ref[...], nd_b2_ref[...]).astype(pred_node_ref.dtype)

    # h_edge[:n_half] + h_edge[n_half:] via an in-VMEM 0/1 selection matmul
    iota_cols = jax.lax.broadcasted_iota(jnp.int32, (n_half, e), 1)
    iota_rows = jax.lax.broadcasted_iota(jnp.int32, (n_half, e), 0)
    sel = jnp.where(jnp.logical_or(iota_cols == iota_rows,
                                   iota_cols == iota_rows + n_half), 1.0, 0.0)
    h_half = jnp.dot(sel, h_edge, preferred_element_type=jnp.float32)  # (n_half, ED)
    pred_half_ref[...] = decode(
        h_half, ed_w1_ref[...], ed_b1_ref[...], ed_g_ref[...],
        ed_be_ref[...], ed_w2_ref[...], ed_b2_ref[...]).astype(pred_half_ref.dtype)


# ----------------------------- parameters -----------------------------
def _gaussian_smearing_linear(stop, num_gaussians):
    offsets = jnp.linspace(0.0, float(stop), num_gaussians).astype(F32)
    diff = float(stop) / (num_gaussians - 1)
    coeff = jnp.full((num_gaussians,), -0.5 / (diff * diff), F32)
    return offsets.reshape(1, num_gaussians), coeff.reshape(1, num_gaussians)


def make_params(key):
    def w(k, fan_in, fan_out):
        return jax.random.normal(k, (fan_in, fan_out), F32) / jnp.sqrt(float(fan_in))

    keys = jax.random.split(key, 24)
    nd, ed, td, ng = NODE_DIM, EDGE_DIM, TIME_DIM, DIST_GAUSSIANS
    time_off, time_coeff = _gaussian_smearing_linear(NUM_TIMESTEPS, td)
    dist_off, dist_coeff = _gaussian_smearing_linear(DIST_CUTOFF, ng)

    params = {
        "w_node_emb": w(keys[0], NUM_NODE_TYPES, nd - td),
        "w_edge_emb": w(keys[1], NUM_EDGE_TYPES, ed - td),
        "time_off": time_off, "time_coeff": time_coeff,
        "denoiser": {
            "dist_off": dist_off, "dist_coeff": dist_coeff,
            # message MLP, split over [h_node[src] | h_edge | dist_gauss]
            "w_msg_n": w(keys[2], nd, nd), "w_msg_e": w(keys[3], ed, nd),
            "w_msg_g": w(keys[4], ng, nd), "b_msg": jnp.zeros((1, nd), F32),
            # node update, split over [h_node | agg | node_time]
            "w_nup_h": w(keys[5], nd, nd), "w_nup_a": w(keys[6], nd, nd),
            "w_nup_t": w(keys[7], 1, nd), "b_nup": jnp.zeros((1, nd), F32),
            # edge embedder, split over [h_edge | dist_gauss]
            "w_eem_e": w(keys[8], ed, ed), "w_eem_g": w(keys[9], ng, ed),
            "b_eem": jnp.zeros((1, ed), F32),
            # edge update, split over [e_emb | h_node[src] | h_node[dst] | edge_time]
            "w_eup_e": w(keys[10], ed, ed), "w_eup_s": w(keys[11], nd, ed),
            "w_eup_d": w(keys[12], nd, ed), "w_eup_t": w(keys[13], 1, ed),
            "b_eup": jnp.zeros((1, ed), F32),
            # position head, split over [h_edge | edge_time]
            "w_pos_e": w(keys[14], ed, 1), "w_pos_t": w(keys[15], 1, 1),
            "b_pos": jnp.zeros((1, 1), F32),
        },
        "node_dec": {
            "w1": w(keys[16], nd, nd), "b1": jnp.zeros((1, nd), F32),
            "gamma": jnp.ones((1, nd), F32), "beta": jnp.zeros((1, nd), F32),
            "w2": w(keys[17], nd, NUM_NODE_TYPES),
            "b2": jnp.zeros((1, NUM_NODE_TYPES), F32),
        },
        "edge_dec": {
            "w1": w(keys[18], ed, ed), "b1": jnp.zeros((1, ed), F32),
            "gamma": jnp.ones((1, ed), F32), "beta": jnp.zeros((1, ed), F32),
            "w2": w(keys[19], ed, NUM_EDGE_TYPES),
            "b2": jnp.zeros((1, NUM_EDGE_TYPES), F32),
        },
    }
    return params


# ----------------------------- forward pass -----------------------------
def moldiff_forward(params, h_node_pert, pos_pert, batch_node, h_edge_pert,
                    edge_index, batch_edge, t):
    n = h_node_pert.shape[0]
    e = h_edge_pert.shape[0]
    n_half = e // 2

    d = params["denoiser"]
    nd_p = params["node_dec"]
    ed_p = params["edge_dec"]

    # tiny per-graph time gather stays in JAX (one scalar per node/edge)
    t_node = jnp.take(t, batch_node).astype(F32)[:, None]      # (N,1)
    t_edge = jnp.take(t, batch_edge).astype(F32)[:, None]      # (E,1)
    src_col = edge_index[0].astype(jnp.int32)[:, None]         # (E,1)
    dst_col = edge_index[1].astype(jnp.int32)[:, None]         # (E,1)
    dst_row = edge_index[1].astype(jnp.int32)[None, :]         # (1,E)

    args = (
        h_node_pert.astype(F32), h_edge_pert.astype(F32), pos_pert.astype(F32),
        t_node, t_edge, src_col, dst_col, dst_row,
        params["w_node_emb"].astype(BF16), params["w_edge_emb"].astype(BF16),
        params["time_off"], params["time_coeff"],
        d["dist_off"], d["dist_coeff"],
        d["w_msg_n"].astype(BF16), d["w_msg_e"].astype(BF16),
        d["w_msg_g"].astype(BF16), d["b_msg"],
        d["w_nup_h"].astype(BF16), d["w_nup_a"].astype(BF16),
        d["w_nup_t"], d["b_nup"],
        d["w_eem_e"].astype(BF16), d["w_eem_g"].astype(BF16), d["b_eem"],
        d["w_eup_e"].astype(BF16), d["w_eup_s"].astype(BF16),
        d["w_eup_d"].astype(BF16), d["w_eup_t"], d["b_eup"],
        d["w_pos_e"].astype(BF16), d["w_pos_t"], d["b_pos"],
        nd_p["w1"].astype(BF16), nd_p["b1"], nd_p["gamma"], nd_p["beta"],
        nd_p["w2"].astype(BF16), nd_p["b2"],
        ed_p["w1"].astype(BF16), ed_p["b1"], ed_p["gamma"], ed_p["beta"],
        ed_p["w2"].astype(BF16), ed_p["b2"],
    )

    kernel = functools.partial(_moldiff_kernel, n_half=n_half,
                               inv_timesteps=1.0 / NUM_TIMESTEPS)
    pred_node, pred_pos, pred_half = pl.pallas_call(
        kernel,
        out_shape=(
            jax.ShapeDtypeStruct((n, NUM_NODE_TYPES), F32),
            jax.ShapeDtypeStruct((n, 3), F32),
            jax.ShapeDtypeStruct((n_half, NUM_EDGE_TYPES), F32),
        ),
        in_specs=[pl.BlockSpec(memory_space=VMEM)] * len(args),
        out_specs=(pl.BlockSpec(memory_space=VMEM),) * 3,
    )(*args)

    return {"pred_node": pred_node, "pred_pos": pred_pos,
            "pred_halfedge": pred_half}


# ----------------------------- main -----------------------------
if __name__ == "__main__":
    key = jax.random.PRNGKey(0)
    k_params, k_nt, k_et, k_pos, k_t = jax.random.split(key, 5)

    G = 2                      # graphs
    NODES_PER_GRAPH = 8
    N = G * NODES_PER_GRAPH    # 16 nodes
    HALF_PER_GRAPH = 6
    N_HALF = G * HALF_PER_GRAPH
    E = 2 * N_HALF             # 24 directed edges

    params = make_params(k_params)

    # node inputs
    node_types = jax.random.randint(k_nt, (N,), 0, NUM_NODE_TYPES)
    h_node_pert = jax.nn.one_hot(node_types, NUM_NODE_TYPES, dtype=F32)     # (16, 8)
    pos_pert = jax.random.normal(k_pos, (N, 3), F32)                        # (16, 3)
    batch_node = jnp.repeat(jnp.arange(G, dtype=jnp.int32), NODES_PER_GRAPH)

    # half-edges (ring graph per molecule), then full directed edge set
    half_src, half_dst = [], []
    for g in range(G):
        base = g * NODES_PER_GRAPH
        for i in range(HALF_PER_GRAPH):
            half_src.append(base + i)
            half_dst.append(base + (i + 1) % NODES_PER_GRAPH)
    halfedge_index = jnp.array([half_src, half_dst], dtype=jnp.int32)       # (2, 12)
    edge_index = jnp.concatenate([halfedge_index, halfedge_index[::-1]], axis=1)  # (2, 24)
    batch_halfedge = jnp.repeat(jnp.arange(G, dtype=jnp.int32), HALF_PER_GRAPH)
    batch_edge = jnp.concatenate([batch_halfedge, batch_halfedge], axis=0)

    halfedge_types = jax.random.randint(k_et, (N_HALF,), 0, NUM_EDGE_TYPES)
    h_half = jax.nn.one_hot(halfedge_types, NUM_EDGE_TYPES, dtype=F32)
    h_edge_pert = jnp.concatenate([h_half, h_half], axis=0)                 # (24, 4)

    t = jax.random.randint(k_t, (G,), 0, NUM_TIMESTEPS)                     # (2,)

    fwd = jax.jit(moldiff_forward)
    out = fwd(params, h_node_pert, pos_pert, batch_node, h_edge_pert,
              edge_index, batch_edge, t)
    jax.block_until_ready(out)

    assert out["pred_node"].shape == (N, NUM_NODE_TYPES)
    assert out["pred_pos"].shape == (N, 3)
    assert out["pred_halfedge"].shape == (N_HALF, NUM_EDGE_TYPES)
    print("KERNEL_OK")
</pallas_src>

<mosaic_0001>
module attributes {stable_mosaic.version = 11 : i64} {
  func.func @_moldiff_kernel(%arg0: memref<16x8xf32, #tpu.memory_space<vmem>>, %arg1: memref<24x4xf32, #tpu.memory_space<vmem>>, %arg2: memref<16x3xf32, #tpu.memory_space<vmem>>, %arg3: memref<16x1xf32, #tpu.memory_space<vmem>>, %arg4: memref<24x1xf32, #tpu.memory_space<vmem>>, %arg5: memref<24x1xi32, #tpu.memory_space<vmem>>, %arg6: memref<24x1xi32, #tpu.memory_space<vmem>>, %arg7: memref<1x24xi32, #tpu.memory_space<vmem>>, %arg8: memref<8x24xbf16, #tpu.memory_space<vmem>>, %arg9: memref<4x24xbf16, #tpu.memory_space<vmem>>, %arg10: memref<1x8xf32, #tpu.memory_space<vmem>>, %arg11: memref<1x8xf32, #tpu.memory_space<vmem>>, %arg12: memref<1x16xf32, #tpu.memory_space<vmem>>, %arg13: memref<1x16xf32, #tpu.memory_space<vmem>>, %arg14: memref<32x32xbf16, #tpu.memory_space<vmem>>, %arg15: memref<32x32xbf16, #tpu.memory_space<vmem>>, %arg16: memref<16x32xbf16, #tpu.memory_space<vmem>>, %arg17: memref<1x32xf32, #tpu.memory_space<vmem>>, %arg18: memref<32x32xbf16, #tpu.memory_space<vmem>>, %arg19: memref<32x32xbf16, #tpu.memory_space<vmem>>, %arg20: memref<1x32xf32, #tpu.memory_space<vmem>>, %arg21: memref<1x32xf32, #tpu.memory_space<vmem>>, %arg22: memref<32x32xbf16, #tpu.memory_space<vmem>>, %arg23: memref<16x32xbf16, #tpu.memory_space<vmem>>, %arg24: memref<1x32xf32, #tpu.memory_space<vmem>>, %arg25: memref<32x32xbf16, #tpu.memory_space<vmem>>, %arg26: memref<32x32xbf16, #tpu.memory_space<vmem>>, %arg27: memref<32x32xbf16, #tpu.memory_space<vmem>>, %arg28: memref<1x32xf32, #tpu.memory_space<vmem>>, %arg29: memref<1x32xf32, #tpu.memory_space<vmem>>, %arg30: memref<32x1xbf16, #tpu.memory_space<vmem>>, %arg31: memref<1x1xf32, #tpu.memory_space<vmem>>, %arg32: memref<1x1xf32, #tpu.memory_space<vmem>>, %arg33: memref<32x32xbf16, #tpu.memory_space<vmem>>, %arg34: memref<1x32xf32, #tpu.memory_space<vmem>>, %arg35: memref<1x32xf32, #tpu.memory_space<vmem>>, %arg36: memref<1x32xf32, #tpu.memory_space<vmem>>, %arg37: memref<32x8xbf16, #tpu.memory_space<vmem>>, %arg38: memref<1x8xf32, #tpu.memory_space<vmem>>, %arg39: memref<32x32xbf16, #tpu.memory_space<vmem>>, %arg40: memref<1x32xf32, #tpu.memory_space<vmem>>, %arg41: memref<1x32xf32, #tpu.memory_space<vmem>>, %arg42: memref<1x32xf32, #tpu.memory_space<vmem>>, %arg43: memref<32x4xbf16, #tpu.memory_space<vmem>>, %arg44: memref<1x4xf32, #tpu.memory_space<vmem>>, %arg45: memref<16x8xf32, #tpu.memory_space<vmem>>, %arg46: memref<16x3xf32, #tpu.memory_space<vmem>>, %arg47: memref<12x4xf32, #tpu.memory_space<vmem>>) attributes {dimension_semantics = [], scalar_prefetch = 0 : i64, scratch_operands = 0 : i64, tpu.core_type = #tpu.core_type<tc>} {
    %c0 = arith.constant 0 : index
    %c0_0 = arith.constant 0 : index
    %0 = vector.load %arg3[%c0, %c0_0] : memref<16x1xf32, #tpu.memory_space<vmem>>, vector<16x1xf32>
    %c0_1 = arith.constant 0 : index
    %c0_2 = arith.constant 0 : index
    %1 = vector.load %arg4[%c0_1, %c0_2] : memref<24x1xf32, #tpu.memory_space<vmem>>, vector<24x1xf32>
    %c0_3 = arith.constant 0 : index
    %c0_4 = arith.constant 0 : index
    %2 = vector.load %arg10[%c0_3, %c0_4] : memref<1x8xf32, #tpu.memory_space<vmem>>, vector<1x8xf32>
    %3 = vector.broadcast %0 : vector<16x1xf32> to vector<16x8xf32>
    %4 = vector.broadcast %2 : vector<1x8xf32> to vector<16x8xf32>
    %5 = arith.subf %3, %4 : vector<16x8xf32>
    %c0_5 = arith.constant 0 : index
    %c0_6 = arith.constant 0 : index
    %6 = vector.load %arg10[%c0_5, %c0_6] : memref<1x8xf32, #tpu.memory_space<vmem>>, vector<1x8xf32>
    %7 = vector.broadcast %1 : vector<24x1xf32> to vector<24x8xf32>
    %8 = vector.broadcast %6 : vector<1x8xf32> to vector<24x8xf32>
    %9 = arith.subf %7, %8 : vector<24x8xf32>
    %c0_7 = arith.constant 0 : index
    %c0_8 = arith.constant 0 : index
    %10 = vector.load %arg0[%c0_7, %c0_8] : memref<16x8xf32, #tpu.memory_space<vmem>>, vector<16x8xf32>
    %c0_9 = arith.constant 0 : index
    %c0_10 = arith.constant 0 : index
    %11 = vector.load %arg8[%c0_9, %c0_10] : memref<8x24xbf16, #tpu.memory_space<vmem>>, vector<8x24xbf16>
    %12 = arith.truncf %10 : vector<16x8xf32> to vector<16x8xbf16>
    %cst = arith.constant dense<0.000000e+00> : vector<16x24xf32>
    %13 = tpu.matmul %12, %11, %cst {dimension_numbers = #tpu.dot_dimension_numbers<[1], [0], [0], [1], [0, 0, 1, 1], [], []>} : vector<16x8xbf16>, vector<8x24xbf16>, vector<16x24xf32> -> vector<16x24xf32>
    %c0_11 = arith.constant 0 : index
    %c0_12 = arith.constant 0 : index
    %14 = vector.load %arg11[%c0_11, %c0_12] : memref<1x8xf32, #tpu.memory_space<vmem>>, vector<1x8xf32>
    %15 = vector.broadcast %14 : vector<1x8xf32> to vector<16x8xf32>
    %16 = arith.mulf %15, %5 : vector<16x8xf32>
    %17 = arith.mulf %16, %5 : vector<16x8xf32>
    %18 = math.exp %17 : vector<16x8xf32>
    %19 = tpu.concatenate %13, %18 in 1 : vector<16x24xf32>, vector<16x8xf32> -> vector<16x32xf32>
    %c0_13 = arith.constant 0 : index
    %c0_14 = arith.constant 0 : index
    %20 = vector.load %arg1[%c0_13, %c0_14] : memref<24x4xf32, #tpu.memory_space<vmem>>, vector<24x4xf32>
    %c0_15 = arith.constant 0 : index
    %c0_16 = arith.constant 0 : index
    %21 = vector.load %arg9[%c0_15, %c0_16] : memref<4x24xbf16, #tpu.memory_space<vmem>>, vector<4x24xbf16>
    %22 = arith.truncf %20 : vector<24x4xf32> to vector<24x4xbf16>
    %cst_17 = arith.constant dense<0.000000e+00> : vector<24x24xf32>
    %23 = tpu.matmul %22, %21, %cst_17 {dimension_numbers = #tpu.dot_dimension_numbers<[1], [0], [0], [1], [0, 0, 1, 1], [], []>} : vector<24x4xbf16>, vector<4x24xbf16>, vector<24x24xf32> -> vector<24x24xf32>
    %c0_18 = arith.constant 0 : index
    %c0_19 = arith.constant 0 : index
    %24 = vector.load %arg11[%c0_18, %c0_19] : memref<1x8xf32, #tpu.memory_space<vmem>>, vector<1x8xf32>
    %25 = vector.broadcast %24 : vector<1x8xf32> to vector<24x8xf32>
    %26 = arith.mulf %25, %9 : vector<24x8xf32>
    %27 = arith.mulf %26, %9 : vector<24x8xf32>
    %28 = math.exp %27 : vector<24x8xf32>
    %29 = tpu.concatenate %23, %28 in 1 : vector<24x24xf32>, vector<24x8xf32> -> vector<24x32xf32>
    %cst_20 = arith.constant 0.00999999977 : f32
    %30 = vector.broadcast %cst_20 : f32 to vector<16x1xf32>
    %31 = arith.mulf %0, %30 : vector<16x1xf32>
    %cst_21 = arith.constant 0.00999999977 : f32
    %32 = vector.broadcast %cst_21 : f32 to vector<24x1xf32>
    %33 = arith.mulf %1, %32 : vector<24x1xf32>
    %34 = tpu.iota {dimensions = array<i32: 1>} : vector<24x16xi32>
    %35 = tpu.iota {dimensions = array<i32: 0>} : vector<16x24xi32>
    %c0_22 = arith.constant 0 : index
    %c0_23 = arith.constant 0 : index
    %36 = vector.load %arg5[%c0_22, %c0_23] : memref<24x1xi32, #tpu.memory_space<vmem>>, vector<24x1xi32>
    %37 = vector.broadcast %36 : vector<24x1xi32> to vector<24x16xi32>
    %38 = arith.cmpi eq, %34, %37 : vector<24x16xi32>
    %cst_24 = arith.constant 1.000000e+00 : f32
    %cst_25 = arith.constant 0.000000e+00 : f32
    %39 = vector.broadcast %cst_24 : f32 to vector<24x16xf32>
    %40 = vector.broadcast %cst_25 : f32 to vector<24x16xf32>
    %41 = arith.select %38, %39, %40 : vector<24x16xi1>, vector<24x16xf32>
    %c0_26 = arith.constant 0 : index
    %c0_27 = arith.constant 0 : index
    %42 = vector.load %arg6[%c0_26, %c0_27] : memref<24x1xi32, #tpu.memory_space<vmem>>, vector<24x1xi32>
    %43 = vector.broadcast %42 : vector<24x1xi32> to vector<24x16xi32>
    %44 = arith.cmpi eq, %34, %43 : vector<24x16xi32>
    %cst_28 = arith.constant 1.000000e+00 : f32
    %cst_29 = arith.constant 0.000000e+00 : f32
    %45 = vector.broadcast %cst_28 : f32 to vector<24x16xf32>
    %46 = vector.broadcast %cst_29 : f32 to vector<24x16xf32>
    %47 = arith.select %44, %45, %46 : vector<24x16xi1>, vector<24x16xf32>
    %c0_30 = arith.constant 0 : index
    %c0_31 = arith.constant 0 : index
    %48 = vector.load %arg7[%c0_30, %c0_31] : memref<1x24xi32, #tpu.memory_space<vmem>>, vector<1x24xi32>
    %49 = vector.broadcast %48 : vector<1x24xi32> to vector<16x24xi32>
    %50 = arith.cmpi eq, %35, %49 : vector<16x24xi32>
    %cst_32 = arith.constant 1.000000e+00 : f32
    %cst_33 = arith.constant 0.000000e+00 : f32
    %51 = vector.broadcast %cst_32 : f32 to vector<16x24xf32>
    %52 = vector.broadcast %cst_33 : f32 to vector<16x24xf32>
    %53 = arith.select %50, %51, %52 : vector<16x24xi1>, vector<16x24xf32>
    %c0_34 = arith.constant 0 : index
    %c0_35 = arith.constant 0 : index
    %54 = vector.load %arg2[%c0_34, %c0_35] : memref<16x3xf32, #tpu.memory_space<vmem>>, vector<16x3xf32>
    %55 = arith.subf %41, %47 : vector<24x16xf32>
    %cst_36 = arith.constant dense<0.000000e+00> : vector<24x3xf32>
    %56 = tpu.matmul %55, %54, %cst_36 {dimension_numbers = #tpu.dot_dimension_numbers<[1], [0], [0], [1], [0, 0, 1, 1], [], []>} : vector<24x16xf32>, vector<16x3xf32>, vector<24x3xf32> -> vector<24x3xf32>
    %57 = arith.mulf %56, %56 : vector<24x3xf32>
    %cst_37 = arith.constant dense<0.000000e+00> : vector<24xf32>
    %58 = vector.multi_reduction <add>, %57, %cst_37 [1] : vector<24x3xf32> to vector<24xf32>
    %59 = vector.shape_cast %58 : vector<24xf32> to vector<24x1xf32>
    %cst_38 = arith.constant 9.99999996E-13 : f32
    %60 = vector.broadcast %cst_38 : f32 to vector<24x1xf32>
    %61 = arith.addf %59, %60 : vector<24x1xf32>
    %62 = math.sqrt %61 : vector<24x1xf32>
    %c0_39 = arith.constant 0 : index
    %c0_40 = arith.constant 0 : index
    %63 = vector.load %arg12[%c0_39, %c0_40] : memref<1x16xf32, #tpu.memory_space<vmem>>, vector<1x16xf32>
    %64 = vector.broadcast %62 : vector<24x1xf32> to vector<24x16xf32>
    %65 = vector.broadcast %63 : vector<1x16xf32> to vector<24x16xf32>
    %66 = arith.subf %64, %65 : vector<24x16xf32>
    %c0_41 = arith.constant 0 : index
    %c0_42 = arith.constant 0 : index
    %67 = vector.load %arg13[%c0_41, %c0_42] : memref<1x16xf32, #tpu.memory_space<vmem>>, vector<1x16xf32>
    %68 = vector.broadcast %67 : vector<1x16xf32> to vector<24x16xf32>
    %69 = arith.mulf %68, %66 : vector<24x16xf32>
    %70 = arith.mulf %69, %66 : vector<24x16xf32>
    %71 = math.exp %70 : vector<24x16xf32>
    %72 = arith.truncf %41 : vector<24x16xf32> to vector<24x16xbf16>
    %73 = arith.truncf %19 : vector<16x32xf32> to vector<16x32xbf16>
    %cst_43 = arith.constant dense<0.000000e+00> : vector<24x32xf32>
    %74 = tpu.matmul %72, %73, %cst_43 {dimension_numbers = #tpu.dot_dimension_numbers<[1], [0], [0], [1], [0, 0, 1, 1], [], []>} : vector<24x16xbf16>, vector<16x32xbf16>, vector<24x32xf32> -> vector<24x32xf32>
    %c0_44 = arith.constant 0 : index
    %c0_45 = arith.constant 0 : index
    %75 = vector.load %arg14[%c0_44, %c0_45] : memref<32x32xbf16, #tpu.memory_space<vmem>>, vector<32x32xbf16>
    %76 = arith.truncf %74 : vector<24x32xf32> to vector<24x32xbf16>
    %cst_46 = arith.constant dense<0.000000e+00> : vector<24x32xf32>
    %77 = tpu.matmul %76, %75, %cst_46 {dimension_numbers = #tpu.dot_dimension_numbers<[1], [0], [0], [1], [0, 0, 1, 1], [], []>} : vector<24x32xbf16>, vector<32x32xbf16>, vector<24x32xf32> -> vector<24x32xf32>
    %c0_47 = arith.constant 0 : index
    %c0_48 = arith.constant 0 : index
    %78 = vector.load %arg15[%c0_47, %c0_48] : memref<32x32xbf16, #tpu.memory_space<vmem>>, vector<32x32xbf16>
    %79 = arith.truncf %29 : vector<24x32xf32> to vector<24x32xbf16>
    %cst_49 = arith.constant dense<0.000000e+00> : vector<24x32xf32>
    %80 = tpu.matmul %79, %78, %cst_49 {dimension_numbers = #tpu.dot_dimension_numbers<[1], [0], [0], [1], [0, 0, 1, 1], [], []>} : vector<24x32xbf16>, vector<32x32xbf16>, vector<24x32xf32> -> vector<24x32xf32>
    %81 = arith.addf %77, %80 : vector<24x32xf32>
    %c0_50 = arith.constant 0 : index
    %c0_51 = arith.constant 0 : index
    %82 = vector.load %arg16[%c0_50, %c0_51] : memref<16x32xbf16, #tpu.memory_space<vmem>>, vector<16x32xbf16>
    %83 = arith.truncf %71 : vector<24x16xf32> to vector<24x16xbf16>
    %cst_52 = arith.constant dense<0.000000e+00> : vector<24x32xf32>
    %84 = tpu.matmul %83, %82, %cst_52 {dimension_numbers = #tpu.dot_dimension_numbers<[1], [0], [0], [1], [0, 0, 1, 1], [], []>} : vector<24x16xbf16>, vector<16x32xbf16>, vector<24x32xf32> -> vector<24x32xf32>
    %85 = arith.addf %81, %84 : vector<24x32xf32>
    %c0_53 = arith.constant 0 : index
    %c0_54 = arith.constant 0 : index
    %86 = vector.load %arg17[%c0_53, %c0_54] : memref<1x32xf32, #tpu.memory_space<vmem>>, vector<1x32xf32>
    %87 = vector.broadcast %86 : vector<1x32xf32> to vector<24x32xf32>
    %88 = arith.addf %85, %87 : vector<24x32xf32>
    %cst_55 = arith.constant 0.000000e+00 : f32
    %89 = vector.broadcast %cst_55 : f32 to vector<24x32xf32>
    %90 = arith.maximumf %88, %89 : vector<24x32xf32>
    %91 = arith.truncf %53 : vector<16x24xf32> to vector<16x24xbf16>
    %92 = arith.truncf %90 : vector<24x32xf32> to vector<24x32xbf16>
    %cst_56 = arith.constant dense<0.000000e+00> : vector<16x32xf32>
    %93 = tpu.matmul %91, %92, %cst_56 {dimension_numbers = #tpu.dot_dimension_numbers<[1], [0], [0], [1], [0, 0, 1, 1], [], []>} : vector<16x24xbf16>, vector<24x32xbf16>, vector<16x32xf32> -> vector<16x32xf32>
    %c0_57 = arith.constant 0 : index
    %c0_58 = arith.constant 0 : index
    %94 = vector.load %arg18[%c0_57, %c0_58] : memref<32x32xbf16, #tpu.memory_space<vmem>>, vector<32x32xbf16>
    %95 = arith.truncf %19 : vector<16x32xf32> to vector<16x32xbf16>
    %cst_59 = arith.constant dense<0.000000e+00> : vector<16x32xf32>
    %96 = tpu.matmul %95, %94, %cst_59 {dimension_numbers = #tpu.dot_dimension_numbers<[1], [0], [0], [1], [0, 0, 1, 1], [], []>} : vector<16x32xbf16>, vector<32x32xbf16>, vector<16x32xf32> -> vector<16x32xf32>
    %c0_60 = arith.constant 0 : index
    %c0_61 = arith.constant 0 : index
    %97 = vector.load %arg19[%c0_60, %c0_61] : memref<32x32xbf16, #tpu.memory_space<vmem>>, vector<32x32xbf16>
    %98 = arith.truncf %93 : vector<16x32xf32> to vector<16x32xbf16>
    %cst_62 = arith.constant dense<0.000000e+00> : vector<16x32xf32>
    %99 = tpu.matmul %98, %97, %cst_62 {dimension_numbers = #tpu.dot_dimension_numbers<[1], [0], [0], [1], [0, 0, 1, 1], [], []>} : vector<16x32xbf16>, vector<32x32xbf16>, vector<16x32xf32> -> vector<16x32xf32>
    %100 = arith.addf %96, %99 : vector<16x32xf32>
    %c0_63 = arith.constant 0 : index
    %c0_64 = arith.constant 0 : index
    %101 = vector.load %arg20[%c0_63, %c0_64] : memref<1x32xf32, #tpu.memory_space<vmem>>, vector<1x32xf32>
    %102 = vector.broadcast %31 : vector<16x1xf32> to vector<16x32xf32>
    %103 = vector.broadcast %101 : vector<1x32xf32> to vector<16x32xf32>
    %104 = arith.mulf %102, %103 : vector<16x32xf32>
    %105 = arith.addf %100, %104 : vector<16x32xf32>
    %c0_65 = arith.constant 0 : index
    %c0_66 = arith.constant 0 : index
    %106 = vector.load %arg21[%c0_65, %c0_66] : memref<1x32xf32, #tpu.memory_space<vmem>>, vector<1x32xf32>
    %107 = vector.broadcast %106 : vector<1x32xf32> to vector<16x32xf32>
    %108 = arith.addf %105, %107 : vector<16x32xf32>
    %109 = arith.addf %19, %108 : vector<16x32xf32>
    %110 = arith.truncf %41 : vector<24x16xf32> to vector<24x16xbf16>
    %111 = arith.truncf %109 : vector<16x32xf32> to vector<16x32xbf16>
    %cst_67 = arith.constant dense<0.000000e+00> : vector<24x32xf32>
    %112 = tpu.matmul %110, %111, %cst_67 {dimension_numbers = #tpu.dot_dimension_numbers<[1], [0], [0], [1], [0, 0, 1, 1], [], []>} : vector<24x16xbf16>, vector<16x32xbf16>, vector<24x32xf32> -> vector<24x32xf32>
    %113 = arith.truncf %47 : vector<24x16xf32> to vector<24x16xbf16>
    %114 = arith.truncf %109 : vector<16x32xf32> to vector<16x32xbf16>
    %cst_68 = arith.constant dense<0.000000e+00> : vector<24x32xf32>
    %115 = tpu.matmul %113, %114, %cst_68 {dimension_numbers = #tpu.dot_dimension_numbers<[1], [0], [0], [1], [0, 0, 1, 1], [], []>} : vector<24x16xbf16>, vector<16x32xbf16>, vector<24x32xf32> -> vector<24x32xf32>
    %c0_69 = arith.constant 0 : index
    %c0_70 = arith.constant 0 : index
    %116 = vector.load %arg22[%c0_69, %c0_70] : memref<32x32xbf16, #tpu.memory_space<vmem>>, vector<32x32xbf16>
    %117 = arith.truncf %29 : vector<24x32xf32> to vector<24x32xbf16>
    %cst_71 = arith.constant dense<0.000000e+00> : vector<24x32xf32>
    %118 = tpu.matmul %117, %116, %cst_71 {dimension_numbers = #tpu.dot_dimension_numbers<[1], [0], [0], [1], [0, 0, 1, 1], [], []>} : vector<24x32xbf16>, vector<32x32xbf16>, vector<24x32xf32> -> vector<24x32xf32>
    %c0_72 = arith.constant 0 : index
    %c0_73 = arith.constant 0 : index
    %119 = vector.load %arg23[%c0_72, %c0_73] : memref<16x32xbf16, #tpu.memory_space<vmem>>, vector<16x32xbf16>
    %120 = arith.truncf %71 : vector<24x16xf32> to vector<24x16xbf16>
    %cst_74 = arith.constant dense<0.000000e+00> : vector<24x32xf32>
    %121 = tpu.matmul %120, %119, %cst_74 {dimension_numbers = #tpu.dot_dimension_numbers<[1], [0], [0], [1], [0, 0, 1, 1], [], []>} : vector<24x16xbf16>, vector<16x32xbf16>, vector<24x32xf32> -> vector<24x32xf32>
    %122 = arith.addf %118, %121 : vector<24x32xf32>
    %c0_75 = arith.constant 0 : index
    %c0_76 = arith.constant 0 : index
    %123 = vector.load %arg24[%c0_75, %c0_76] : memref<1x32xf32, #tpu.memory_space<vmem>>, vector<1x32xf32>
    %124 = vector.broadcast %123 : vector<1x32xf32> to vector<24x32xf32>
    %125 = arith.addf %122, %124 : vector<24x32xf32>
    %c0_77 = arith.constant 0 : index
    %c0_78 = arith.constant 0 : index
    %126 = vector.load %arg25[%c0_77, %c0_78] : memref<32x32xbf16, #tpu.memory_space<vmem>>, vector<32x32xbf16>
    %127 = arith.truncf %125 : vector<24x32xf32> to vector<24x32xbf16>
    %cst_79 = arith.constant dense<0.000000e+00> : vector<24x32xf32>
    %128 = tpu.matmul %127, %126, %cst_79 {dimension_numbers = #tpu.dot_dimension_numbers<[1], [0], [0], [1], [0, 0, 1, 1], [], []>} : vector<24x32xbf16>, vector<32x32xbf16>, vector<24x32xf32> -> vector<24x32xf32>
    %c0_80 = arith.constant 0 : index
    %c0_81 = arith.constant 0 : index
    %129 = vector.load %arg26[%c0_80, %c0_81] : memref<32x32xbf16, #tpu.memory_space<vmem>>, vector<32x32xbf16>
    %130 = arith.truncf %112 : vector<24x32xf32> to vector<24x32xbf16>
    %cst_82 = arith.constant dense<0.000000e+00> : vector<24x32xf32>
    %131 = tpu.matmul %130, %129, %cst_82 {dimension_numbers = #tpu.dot_dimension_numbers<[1], [0], [0], [1], [0, 0, 1, 1], [], []>} : vector<24x32xbf16>, vector<32x32xbf16>, vector<24x32xf32> -> vector<24x32xf32>
    %132 = arith.addf %128, %131 : vector<24x32xf32>
    %c0_83 = arith.constant 0 : index
    %c0_84 = arith.constant 0 : index
    %133 = vector.load %arg27[%c0_83, %c0_84] : memref<32x32xbf16, #tpu.memory_space<vmem>>, vector<32x32xbf16>
    %134 = arith.truncf %115 : vector<24x32xf32> to vector<24x32xbf16>
    %cst_85 = arith.constant dense<0.000000e+00> : vector<24x32xf32>
    %135 = tpu.matmul %134, %133, %cst_85 {dimension_numbers = #tpu.dot_dimension_numbers<[1], [0], [0], [1], [0, 0, 1, 1], [], []>} : vector<24x32xbf16>, vector<32x32xbf16>, vector<24x32xf32> -> vector<24x32xf32>
    %136 = arith.addf %132, %135 : vector<24x32xf32>
    %c0_86 = arith.constant 0 : index
    %c0_87 = arith.constant 0 : index
    %137 = vector.load %arg28[%c0_86, %c0_87] : memref<1x32xf32, #tpu.memory_space<vmem>>, vector<1x32xf32>
    %138 = vector.broadcast %33 : vector<24x1xf32> to vector<24x32xf32>
    %139 = vector.broadcast %137 : vector<1x32xf32> to vector<24x32xf32>
    %140 = arith.mulf %138, %139 : vector<24x32xf32>
    %141 = arith.addf %136, %140 : vector<24x32xf32>
    %c0_88 = arith.constant 0 : index
    %c0_89 = arith.constant 0 : index
    %142 = vector.load %arg29[%c0_88, %c0_89] : memref<1x32xf32, #tpu.memory_space<vmem>>, vector<1x32xf32>
    %143 = vector.broadcast %142 : vector<1x32xf32> to vector<24x32xf32>
    %144 = arith.addf %141, %143 : vector<24x32xf32>
    %145 = arith.addf %29, %144 : vector<24x32xf32>
    %c0_90 = arith.constant 0 : index
    %c0_91 = arith.constant 0 : index
    %146 = vector.load %arg30[%c0_90, %c0_91] : memref<32x1xbf16, #tpu.memory_space<vmem>>, vector<32x1xbf16>
    %147 = arith.truncf %145 : vector<24x32xf32> to vector<24x32xbf16>
    %cst_92 = arith.constant dense<0.000000e+00> : vector<24x1xf32>
    %148 = tpu.matmul %147, %146, %cst_92 {dimension_numbers = #tpu.dot_dimension_numbers<[1], [0], [0], [1], [0, 0, 1, 1], [], []>} : vector<24x32xbf16>, vector<32x1xbf16>, vector<24x1xf32> -> vector<24x1xf32>
    %c0_93 = arith.constant 0 : index
    %c0_94 = arith.constant 0 : index
    %149 = vector.load %arg31[%c0_93, %c0_94] : memref<1x1xf32, #tpu.memory_space<vmem>>, vector<1x1xf32>
    %150 = vector.broadcast %149 : vector<1x1xf32> to vector<24x1xf32>
    %151 = arith.mulf %33, %150 : vector<24x1xf32>
    %152 = arith.addf %148, %151 : vector<24x1xf32>
    %c0_95 = arith.constant 0 : index
    %c0_96 = arith.constant 0 : index
    %153 = vector.load %arg32[%c0_95, %c0_96] : memref<1x1xf32, #tpu.memory_space<vmem>>, vector<1x1xf32>
    %154 = vector.broadcast %153 : vector<1x1xf32> to vector<24x1xf32>
    %155 = arith.addf %152, %154 : vector<24x1xf32>
    %156 = vector.broadcast %155 : vector<24x1xf32> to vector<24x3xf32>
    %157 = arith.mulf %56, %156 : vector<24x3xf32>
    %cst_97 = arith.constant 1.000000e+00 : f32
    %158 = vector.broadcast %cst_97 : f32 to vector<24x1xf32>
    %159 = arith.addf %62, %158 : vector<24x1xf32>
    %160 = vector.broadcast %159 : vector<24x1xf32> to vector<24x3xf32>
    %161 = arith.divf %157, %160 : vector<24x3xf32>
    %cst_98 = arith.constant dense<0.000000e+00> : vector<16x3xf32>
    %162 = tpu.matmul %53, %161, %cst_98 {dimension_numbers = #tpu.dot_dimension_numbers<[1], [0], [0], [1], [0, 0, 1, 1], [], []>} : vector<16x24xf32>, vector<24x3xf32>, vector<16x3xf32> -> vector<16x3xf32>
    %163 = arith.addf %54, %162 : vector<16x3xf32>
    %c0_99 = arith.constant 0 : index
    %c0_100 = arith.constant 0 : index
    %164 = vector.load %arg46[%c0_99, %c0_100] : memref<16x3xf32, #tpu.memory_space<vmem>>, vector<16x3xf32>
    tpu.vector_store %arg46[%c0_99, %c0_100], %163 {strides = array<i32>} : memref<16x3xf32, #tpu.memory_space<vmem>>, vector<16x3xf32>,
    %c0_101 = arith.constant 0 : index
    %c0_102 = arith.constant 0 : index
    %165 = vector.load %arg33[%c0_101, %c0_102] : memref<32x32xbf16, #tpu.memory_space<vmem>>, vector<32x32xbf16>
    %c0_103 = arith.constant 0 : index
    %c0_104 = arith.constant 0 : index
    %166 = vector.load %arg34[%c0_103, %c0_104] : memref<1x32xf32, #tpu.memory_space<vmem>>, vector<1x32xf32>
    %c0_105 = arith.constant 0 : index
    %c0_106 = arith.constant 0 : index
    %167 = vector.load %arg35[%c0_105, %c0_106] : memref<1x32xf32, #tpu.memory_space<vmem>>, vector<1x32xf32>
    %c0_107 = arith.constant 0 : index
    %c0_108 = arith.constant 0 : index
    %168 = vector.load %arg36[%c0_107, %c0_108] : memref<1x32xf32, #tpu.memory_space<vmem>>, vector<1x32xf32>
    %c0_109 = arith.constant 0 : index
    %c0_110 = arith.constant 0 : index
    %169 = vector.load %arg37[%c0_109, %c0_110] : memref<32x8xbf16, #tpu.memory_space<vmem>>, vector<32x8xbf16>
    %c0_111 = arith.constant 0 : index
    %c0_112 = arith.constant 0 : index
    %170 = vector.load %arg38[%c0_111, %c0_112] : memref<1x8xf32, #tpu.memory_space<vmem>>, vector<1x8xf32>
    %171 = arith.truncf %109 : vector<16x32xf32> to vector<16x32xbf16>
    %cst_113 = arith.constant dense<0.000000e+00> : vector<16x32xf32>
    %172 = tpu.matmul %171, %165, %cst_113 {dimension_numbers = #tpu.dot_dimension_numbers<[1], [0], [0], [1], [0, 0, 1, 1], [], []>} : vector<16x32xbf16>, vector<32x32xbf16>, vector<16x32xf32> -> vector<16x32xf32>
    %173 = vector.broadcast %166 : vector<1x32xf32> to vector<16x32xf32>
    %174 = arith.addf %172, %173 : vector<16x32xf32>
    %cst_114 = arith.constant dense<0.000000e+00> : vector<16xf32>
    %175 = vector.multi_reduction <add>, %174, %cst_114 [1] : vector<16x32xf32> to vector<16xf32>
    %176 = vector.shape_cast %175 : vector<16xf32> to vector<16x1xf32>
    %cst_115 = arith.constant 3.200000e+01 : f32
    %177 = vector.broadcast %cst_115 : f32 to vector<16x1xf32>
    %178 = arith.divf %176, %177 : vector<16x1xf32>
    %179 = vector.broadcast %178 : vector<16x1xf32> to vector<16x32xf32>
    %180 = arith.subf %174, %179 : vector<16x32xf32>
    %181 = arith.mulf %180, %180 : vector<16x32xf32>
    %cst_116 = arith.constant dense<0.000000e+00> : vector<16xf32>
    %182 = vector.multi_reduction <add>, %181, %cst_116 [1] : vector<16x32xf32> to vector<16xf32>
    %183 = vector.shape_cast %182 : vector<16xf32> to vector<16x1xf32>
    %cst_117 = arith.constant 3.200000e+01 : f32
    %184 = vector.broadcast %cst_117 : f32 to vector<16x1xf32>
    %185 = arith.divf %183, %184 : vector<16x1xf32>
    %186 = vector.broadcast %178 : vector<16x1xf32> to vector<16x32xf32>
    %187 = arith.subf %174, %186 : vector<16x32xf32>
    %cst_118 = arith.constant 9.99999974E-6 : f32
    %188 = vector.broadcast %cst_118 : f32 to vector<16x1xf32>
    %189 = arith.addf %185, %188 : vector<16x1xf32>
    %190 = math.rsqrt %189 : vector<16x1xf32>
    %191 = vector.broadcast %190 : vector<16x1xf32> to vector<16x32xf32>
    %192 = arith.mulf %187, %191 : vector<16x32xf32>
    %193 = vector.broadcast %167 : vector<1x32xf32> to vector<16x32xf32>
    %194 = arith.mulf %192, %193 : vector<16x32xf32>
    %195 = vector.broadcast %168 : vector<1x32xf32> to vector<16x32xf32>
    %196 = arith.addf %194, %195 : vector<16x32xf32>
    %cst_119 = arith.constant 0.000000e+00 : f32
    %197 = vector.broadcast %cst_119 : f32 to vector<16x32xf32>
    %198 = arith.maximumf %196, %197 : vector<16x32xf32>
    %199 = arith.truncf %198 : vector<16x32xf32> to vector<16x32xbf16>
    %cst_120 = arith.constant dense<0.000000e+00> : vector<16x8xf32>
    %200 = tpu.matmul %199, %169, %cst_120 {dimension_numbers = #tpu.dot_dimension_numbers<[1], [0], [0], [1], [0, 0, 1, 1], [], []>} : vector<16x32xbf16>, vector<32x8xbf16>, vector<16x8xf32> -> vector<16x8xf32>
    %201 = vector.broadcast %170 : vector<1x8xf32> to vector<16x8xf32>
    %202 = arith.addf %200, %201 : vector<16x8xf32>
    %c0_121 = arith.constant 0 : index
    %c0_122 = arith.constant 0 : index
    %203 = vector.load %arg45[%c0_121, %c0_122] : memref<16x8xf32, #tpu.memory_space<vmem>>, vector<16x8xf32>
    tpu.vector_store %arg45[%c0_121, %c0_122], %202 {strides = array<i32>} : memref<16x8xf32, #tpu.memory_space<vmem>>, vector<16x8xf32>,
    %204 = tpu.iota {dimensions = array<i32: 1>} : vector<12x24xi32>
    %205 = tpu.iota {dimensions = array<i32: 0>} : vector<12x24xi32>
    %206 = arith.cmpi eq, %204, %205 : vector<12x24xi32>
    %c12_i32 = arith.constant 12 : i32
    %207 = vector.broadcast %c12_i32 : i32 to vector<12x24xi32>
    %208 = arith.addi %205, %207 : vector<12x24xi32>
    %209 = arith.cmpi eq, %204, %208 : vector<12x24xi32>
    %210 = arith.ori %206, %209 : vector<12x24xi1>
    %cst_123 = arith.constant 1.000000e+00 : f32
    %cst_124 = arith.constant 0.000000e+00 : f32
    %211 = vector.broadcast %cst_123 : f32 to vector<12x24xf32>
    %212 = vector.broadcast %cst_124 : f32 to vector<12x24xf32>
    %213 = arith.select %210, %211, %212 : vector<12x24xi1>, vector<12x24xf32>
    %cst_125 = arith.constant dense<0.000000e+00> : vector<12x32xf32>
    %214 = tpu.matmul %213, %145, %cst_125 {dimension_numbers = #tpu.dot_dimension_numbers<[1], [0], [0], [1], [0, 0, 1, 1], [], []>} : vector<12x24xf32>, vector<24x32xf32>, vector<12x32xf32> -> vector<12x32xf32>
    %c0_126 = arith.constant 0 : index
    %c0_127 = arith.constant 0 : index
    %215 = vector.load %arg39[%c0_126, %c0_127] : memref<32x32xbf16, #tpu.memory_space<vmem>>, vector<32x32xbf16>
    %c0_128 = arith.constant 0 : index
    %c0_129 = arith.constant 0 : index
    %216 = vector.load %arg40[%c0_128, %c0_129] : memref<1x32xf32, #tpu.memory_space<vmem>>, vector<1x32xf32>
    %c0_130 = arith.constant 0 : index
    %c0_131 = arith.constant 0 : index
    %217 = vector.load %arg41[%c0_130, %c0_131] : memref<1x32xf32, #tpu.memory_space<vmem>>, vector<1x32xf32>
    %c0_132 = arith.constant 0 : index
    %c0_133 = arith.constant 0 : index
    %218 = vector.load %arg42[%c0_132, %c0_133] : memref<1x32xf32, #tpu.memory_space<vmem>>, vector<1x32xf32>
    %c0_134 = arith.constant 0 : index
    %c0_135 = arith.constant 0 : index
    %219 = vector.load %arg43[%c0_134, %c0_135] : memref<32x4xbf16, #tpu.memory_space<vmem>>, vector<32x4xbf16>
    %c0_136 = arith.constant 0 : index
    %c0_137 = arith.constant 0 : index
    %220 = vector.load %arg44[%c0_136, %c0_137] : memref<1x4xf32, #tpu.memory_space<vmem>>, vector<1x4xf32>
    %221 = arith.truncf %214 : vector<12x32xf32> to vector<12x32xbf16>
    %cst_138 = arith.constant dense<0.000000e+00> : vector<12x32xf32>
    %222 = tpu.matmul %221, %215, %cst_138 {dimension_numbers = #tpu.dot_dimension_numbers<[1], [0], [0], [1], [0, 0, 1, 1], [], []>} : vector<12x32xbf16>, vector<32x32xbf16>, vector<12x32xf32> -> vector<12x32xf32>
    %223 = vector.broadcast %216 : vector<1x32xf32> to vector<12x32xf32>
    %224 = arith.addf %222, %223 : vector<12x32xf32>
    %cst_139 = arith.constant dense<0.000000e+00> : vector<12xf32>
    %225 = vector.multi_reduction <add>, %224, %cst_139 [1] : vector<12x32xf32> to vector<12xf32>
    %226 = vector.shape_cast %225 : vector<12xf32> to vector<12x1xf32>
    %cst_140 = arith.constant 3.200000e+01 : f32
    %227 = vector.broadcast %cst_140 : f32 to vector<12x1xf32>
    %228 = arith.divf %226, %227 : vector<12x1xf32>
    %229 = vector.broadcast %228 : vector<12x1xf32> to vector<12x32xf32>
    %230 = arith.subf %224, %229 : vector<12x32xf32>
    %231 = arith.mulf %230, %230 : vector<12x32xf32>
    %cst_141 = arith.constant dense<0.000000e+00> : vector<12xf32>
    %232 = vector.multi_reduction <add>, %231, %cst_141 [1] : vector<12x32xf32> to vector<12xf32>
    %233 = vector.shape_cast %232 : vector<12xf32> to vector<12x1xf32>
    %cst_142 = arith.constant 3.200000e+01 : f32
    %234 = vector.broadcast %cst_142 : f32 to vector<12x1xf32>
    %235 = arith.divf %233, %234 : vector<12x1xf32>
    %236 = vector.broadcast %228 : vector<12x1xf32> to vector<12x32xf32>
    %237 = arith.subf %224, %236 : vector<12x32xf32>
    %cst_143 = arith.constant 9.99999974E-6 : f32
    %238 = vector.broadcast %cst_143 : f32 to vector<12x1xf32>
    %239 = arith.addf %235, %238 : vector<12x1xf32>
    %240 = math.rsqrt %239 : vector<12x1xf32>
    %241 = vector.broadcast %240 : vector<12x1xf32> to vector<12x32xf32>
    %242 = arith.mulf %237, %241 : vector<12x32xf32>
    %243 = vector.broadcast %217 : vector<1x32xf32> to vector<12x32xf32>
    %244 = arith.mulf %242, %243 : vector<12x32xf32>
    %245 = vector.broadcast %218 : vector<1x32xf32> to vector<12x32xf32>
    %246 = arith.addf %244, %245 : vector<12x32xf32>
    %cst_144 = arith.constant 0.000000e+00 : f32
    %247 = vector.broadcast %cst_144 : f32 to vector<12x32xf32>
    %248 = arith.maximumf %246, %247 : vector<12x32xf32>
    %249 = arith.truncf %248 : vector<12x32xf32> to vector<12x32xbf16>
    %cst_145 = arith.constant dense<0.000000e+00> : vector<12x4xf32>
    %250 = tpu.matmul %249, %219, %cst_145 {dimension_numbers = #tpu.dot_dimension_numbers<[1], [0], [0], [1], [0, 0, 1, 1], [], []>} : vector<12x32xbf16>, vector<32x4xbf16>, vector<12x4xf32> -> vector<12x4xf32>
    %251 = vector.broadcast %220 : vector<1x4xf32> to vector<12x4xf32>
    %252 = arith.addf %250, %251 : vector<12x4xf32>
    %c0_146 = arith.constant 0 : index
    %c0_147 = arith.constant 0 : index
    %253 = vector.load %arg47[%c0_146, %c0_147] : memref<12x4xf32, #tpu.memory_space<vmem>>, vector<12x4xf32>
    tpu.vector_store %arg47[%c0_146, %c0_147], %252 {strides = array<i32>} : memref<12x4xf32, #tpu.memory_space<vmem>>, vector<12x4xf32>,
    return
  }
}

</mosaic_0001>

<bundles_post_ra>
// kernel: moldiff_forward.1
= control target key start
LH: loop header
LB: loop body
LE: loop exit
PB: predicated region body
PF: predicated region fallthrough
CT: control target
= control target key end

     0   :  { %v1893_v0 = vmov 0   ;;  %s1894_s3 = smov 5   ;;  %s1895_s7 = smov 3   ;;  %vm243_vm0 = vcmask 1043456   ;;  %vm239_vm1 = vcmask 64512   ;;  %v351_v30 = vlaneseq  ;;  %s2452_s0 = inlined_call_operand.smem [shape: u32[48], index: -1, kind: input, shape index: {}] }
   0x1   :  { %1831 = vset.pattern.permute.xlu2 %v1893_v0  ;;  %1830 = vset.pattern.permute.xlu1 %v1893_v0  ;;  %s1555_s6 = sld [smem:[%s2452_s0 + %s1894_s3]]   ;;  %s1896_s11 = smov 6   ;;  %v1903_v36 = vmov 0.0   ;;  %vm403_vm6 = vcmask 130048   ;;  %vm281_vm9 = vcmask 195584   ;;  %vm297_vm10 = vcmask 1041408  }
   0x2   :  { %1829 = vset.pattern.permute.xlu0 %v1893_v0  ;;  %s1553_s10 = sld [smem:[%s2452_s0 + %s1895_s7]]   ;;  %s1897_s15 = smov 10   ;;  %v2009_v31 = vand.u32 127, %v351_v30  ;;  %vm290_vm11 = vcmask 31744   ;;  %vm442_vm12 = vcmask 23552   ;;  %vm565_vm13 = vcmask 261120  }
   0x3   :  { %s1556_s14 = sld [smem:[%s2452_s0 + %s1896_s11]]   ;;  %s1898_s19 = smov 11  }
   0x4   :  { %s1960_s18 = sld [smem:[%s2452_s0 + %s1897_s15]]   ;;  %s1899_s23 = smov 4  }
   0x5   :  { %s1965_s22 = sld [smem:[%s2452_s0 + %s1898_s19]]   ;;  %s1900_s27 = smov 8  }
   0x6   :  { %s1976_s26 = sld [smem:[%s2452_s0 + %s1899_s23]]   ;;  %s1901_s4 = smov 2  }
   0x7   :  { %v357_v1 = vld [vmem:[%s1555_s6 + $0x8] sm:$0xff]  ;;  %v356_v2 = vld [vmem:[%s1555_s6] sm:$0xff]  ;;  %v358_v8 = vld [vmem:[%s1555_s6 + $0x10] sm:$0xff]  ;;  %s1558_s30 = sld [smem:[%s2452_s0 + %s1900_s27]]   ;;  %s1902_s8 = smov 24  }
   0x8   :  { %363 = vperm.xlu1 %1830, %v357_v1   ;;  %360 = vperm.xlu0 %1829, %v356_v2   ;;  %v1967_v3 = vld [vmem:[%s1553_s10] sm:$0xff]  ;;  %v1970_v6 = vld [vmem:[%s1553_s10 + $0x8] sm:$0xff]  ;;  %s1_s3 = sld [smem:[%s2452_s0]]   ;;  %s1904_s9 = smov 9  }
   0x9   :  { %204 = vperm.xlu2 %1831, %v1967_v3   ;;  %v375_v4 = vld [vmem:[%s1556_s14 + $0x8] sm:$0xff]  ;;  %v374_v5 = vld [vmem:[%s1556_s14] sm:$0xff]  ;;  %v376_v7 = vld [vmem:[%s1556_s14 + $0x10] sm:$0xff]  ;;  %s1993_s7 = sld [smem:[%s2452_s0 + %s1901_s4]]   ;;  %s1905_s13 = smov 1  }
   0xa   :  { %v1996_v15 = vld [vmem:[%s1960_s18] ss:$0 sm:$0xff]  ;;  %s1559_s12 = sld [smem:[%s2452_s0 + %s1904_s9]]   ;;  %s1906_s17 = smov 12  }
   0xb   :  { %v1999_v16 = vld [vmem:[%s1965_s22] ss:$0 sm:$0xff]  ;;  %s1551_s16 = sld [smem:[%s2452_s0 + %s1905_s13]]   ;;  %s1907_s21 = smov 20  }
   0xc   :  { %v1979_v9 = vld [vmem:[%s1976_s26] sm:$0xff]  ;;  %v2012_v32 = vld [vmem:[%s1976_s26 + $0x8] sm:$0xff]  ;;  %v2023_v40 = vld [vmem:[%s1976_s26 + $0x10] sm:$0xff]  ;;  %s2084_s20 = sld [smem:[%s2452_s0 + %s1906_s17]]   ;;  %s1908_s25 = smov 13  }
   0xd   :  { %v237_v10 = vld [vmem:[%s1558_s30] sm:$0xf]  ;;  %s2091_s24 = sld [smem:[%s2452_s0 + %s1907_s21]]   ;;  %s1909_s29 = smov 28  }
   0xe   :  { %v245_v11 = vsel %vm243_vm0, %v237_v10, 0  ;;  %v235_v12 = vld [vmem:[%s1_s3] sm:$0xff]  ;;  %v236_v13 = vld [vmem:[%s1_s3 + $0x8] sm:$0xff]  ;;  %s2097_s28 = sld [smem:[%s2452_s0 + %s1908_s25]]   ;;  %s1910_s3 = smov 14  }
   0xf   :  { %254 = vmatpush.bf16.msra.mxu0 %v245_v11  ;;  %v238_v14 = vpack.c.bf16 %v236_v13, %v235_v12  ;;  %v399_v19 = vld [vmem:[%s1993_s7 + $0x8] sm:$0xff]  ;;  %v398_v20 = vld [vmem:[%s1993_s7] sm:$0xff]  ;;  %s2110_s2 = sld [smem:[%s2452_s0 + %s1909_s29]]   ;;  %s1911_s9 = smov 15  }
  0x10   :  { %381 = vperm.xlu1 %1830, %v375_v4   ;;  %378 = vperm.xlu0 %1829, %v374_v5   ;;  %v287_v59 = vld [vmem:[%s1559_s12] sm:$0x3]  ;;  %s1564_s6 = sld [smem:[%s2452_s0 + %s1910_s3]]   ;;  %s1912_s13 = smov 16  }
  0x11   :  { %209 = vperm.xlu2 %1831, %v1970_v6   ;;  %427 = vmatpush.msra.mxu2 %v399_v19  ;;  %v299_v61 = vsel %vm297_vm10, %v287_v59, 0  ;;  %v284_v62 = vld [vmem:[%s1551_s16] sm:$0xff]  ;;  %v285_v63 = vld [vmem:[%s1551_s16 + $0x8] sm:$0xff]  ;;  %v286_v2 = vld [vmem:[%s1551_s16 + $0x10] sm:$0xff]  ;;  %s1565_s12 = sld [smem:[%s2452_s0 + %s1911_s9]]   ;;  %s1913_s17 = smov 23  }
  0x12   :  { %1598 = vmatmul.msk.bf16.vlgmr.msra.gmra.mxu0 %vm239_vm1, %v238_v14  ;;  %308 = vmatpush.bf16.msra.mxu1 %v299_v61  ;;  %v288_v0 = vpack.c.bf16 %v285_v63, %v284_v62  ;;  %v289_v4 = vpack.c.bf16 %v286_v2, %v286_v2  ;;  %s1566_s16 = sld [smem:[%s2452_s0 + %s1912_s13]]   ;;  %s1914_s21 = smov 17  }
  0x13   :  { %428 = vmatpush.msra.mxu2 %v398_v20  ;;  %s2181_s25 = sld [smem:[%s2452_s0 + %s1914_s21]]   ;;  %s1915_s26 = smov 7  }
  0x14   :  { %s1557_s29 = sld [smem:[%s2452_s0 + %s1915_s26]]   ;;  %s1916_s30 = smov 18  }
  0x15   :  { %1599 = vmatmul.msk.bf16.vlgmr.msra.gmra.mxu1 %vm290_vm11, %v288_v0  ;;  %s1568_s4 = sld [smem:[%s2452_s0 + %s1916_s30]]   ;;  %s1917_s5 = smov 22  }
  0x16   :  { %s1572_s10 = sld [smem:[%s2452_s0 + %s1917_s5]]   ;;  %s1918_s14 = smov 21  }
  0x17   :  { %s1574_s13 = sld [smem:[%s2452_s0 + %s1902_s8]]   ;;  %s1919_s18 = smov 19  }
  0x18   :  { %384 = vperm.xlu1 %1830, %v376_v7   ;;  %366 = vperm.xlu0 %1829, %v358_v8   ;;  %v1755_v2 = vld [vmem:[%s1566_s16] sm:$0xff]  ;;  %s1569_s21 = sld [smem:[%s2452_s0 + %s1919_s18]]   ;;  %s1926_s18 = smov 30  }
  0x19   :  { %649 = vmatpush.bf16.msrb.mxu1 %v1755_v2  ;;  %s1936_s23 = smov 42   ;;  %s1937_s27 = smov 37  }
  0x1a   :  { %s2397_s26 = sld [smem:[%s2452_s0 + %s1936_s23]]   ;;  %s1938_s30 = smov 38  }
  0x1b   :  { %s1939_s5 = smov 44   ;;  %s1940_s11 = smov 43  }
  0x1c   :  { %s1941_s15 = smov 45   ;;  %s1942_s19 = smov 47  }
  0x20   :  { %219 = vperm.xlu1 %1830, %v1979_v9  }
  0x25   :  { %1600 = vmatmul.msk.bf16.gmra.mxu1 %vm290_vm11, %v289_v4 }
  0x63   :  { %v205_v17 = vpop.permute.xlu2 %204 }
  0x64   :  { %v215_v18 = vsub.f32 %v205_v17, %v1996_v15 }
  0x66   :  { %v265_v21 = vmul.f32 %v1999_v16, %v215_v18 }
  0x68   :  { %v267_v22 = vmul.f32 %v265_v21, %v215_v18 }
  0x6a   :  { %v269_v23 = vmul.f32 1.442695, %v267_v22 }
  0x6b   :  { %v210_v24 = vpop.permute.xlu2 %209 }
  0x6c   :  { %1853 = vpow2.f32 %v269_v23  ;;  %v216_v25 = vsub.f32 %v210_v24, %v1996_v15 }
  0x6e   :  { %v266_v26 = vmul.f32 %v1999_v16, %v216_v25 }
  0x70   :  { %v268_v27 = vmul.f32 %v266_v26, %v216_v25 }
  0x72   :  { %v1854_v28 = vpop.eup %1853  ;;  %v271_v29 = vmul.f32 1.442695, %v268_v27 }
  0x73   :  { %275 = vrot.lane.b32.xlu2 %v1854_v28, %s1902_s8 }
  0x74   :  { %1855 = vpow2.f32 %v271_v29 }
  0x7a   :  { %v1856_v33 = vpop.eup %1855  ;;  %v364_v34 = vpop.permute.xlu1 %363 }
  0x7b   :  { %v361_v35 = vpop.permute.xlu0 %360  ;;  %vm369_vm2 = vcmp.eq.s32.totalorder %v2009_v31, %v364_v34  ;;  %224 = vperm.xlu2 %1831, %v2012_v32   ;;  %277 = vrot.lane.b32.xlu0 %v1856_v33, %s1902_s8 }
  0x7c   :  { %vm368_vm3 = vcmp.eq.s32.totalorder %v2009_v31, %v361_v35  ;;  %v372_v37 = vsel %vm369_vm2, 1.0, %v1903_v36 }
  0x7d   :  { %v371_v38 = vsel %vm368_vm3, 1.0, %v1903_v36 }
  0x7e   :  { %v2020_v39 = vpack.c.bf16 %v372_v37, %v371_v38 }
  0x82   :  { %v382_v41 = vpop.permute.xlu1 %381 }
  0x83   :  { %v379_v42 = vpop.permute.xlu0 %378  ;;  %vm387_vm4 = vcmp.eq.s32.totalorder %v2009_v31, %v382_v41  ;;  %229 = vperm.xlu0 %1829, %v2023_v40  }
  0x84   :  { %vm386_vm5 = vcmp.eq.s32.totalorder %v2009_v31, %v379_v42  ;;  %v2029_v43 = vsel %vm387_vm4, 1.0, %v1903_v36  ;;  %v346_v42 = vmul.f32 0.01, %v1967_v3  ;;  %v1752_v3 = vld [vmem:[%s1564_s6 + $0x8] sm:$0xff] }
  0x85   :  { %v2032_v44 = vsel %vm386_vm5, 1.0, %v1903_v36  ;;  %v401_v49 = vsub.f32 %v372_v37, %v2029_v43  ;;  %v347_v37 = vmul.f32 0.01, %v1970_v6  ;;  %v2127_v6 = vmul.f32 0.01, %v2012_v32  ;;  %614 = vmatpush.bf16.msrb.mxu2 %v1752_v3  ;;  %v1754_v32 = vld [vmem:[%s1565_s12 + $0x8] sm:$0xff] }
  0x86   :  { %v400_v45 = vsub.f32 %v371_v38, %v2032_v44  ;;  %v808_v46 = vpack.c.bf16 %v2029_v43, %v2032_v44  ;;  %578 = vmatpush.bf16.msrb.mxu0 %v1754_v32 }
  0x88   :  { %1601 = vmatmul.msk.f32.vlgmr.msra.gmra.mxu2 %vm403_vm6, %v400_v45  ;;  %v2123_v45 = vmul.f32 0.01, %v1979_v9 }
  0x8a   :  { %v385_v47 = vpop.permute.xlu1 %384 }
  0x8b   :  { %v367_v48 = vpop.permute.xlu0 %366  ;;  %vm388_vm7 = vcmp.eq.s32.totalorder %v2009_v31, %v385_v47 }
  0x8c   :  { %vm370_vm8 = vcmp.eq.s32.totalorder %v2009_v31, %v367_v48  ;;  %v2043_v50 = vsel %vm388_vm7, 1.0, %v1903_v36  ;;  %v1753_v48 = vld [vmem:[%s1565_s12] sm:$0xff] }
  0x8d   :  { %v373_v51 = vsel %vm370_vm8, 1.0, %v1903_v36  ;;  %579 = vmatpush.bf16.msrb.mxu0 %v1753_v48 }
  0x8e   :  { %v402_v52 = vsub.f32 %v373_v51, %v2043_v50  ;;  %v2068_v1 = vpack.c.bf16 %v373_v51, %v373_v51 }
  0x8f   :  { %v256_v53 = vpop.f32.mrf.mxu0 }
  0x90   :  { %1602 = vmatmul.msk.f32.gmra.mxu2 %vm403_vm6, %v401_v49 }
  0x92   :  { %v220_v14 = vpop.permute.xlu1 %219  ;;  %v310_v9 = vpop.f32.mrf.mxu1 }
  0x93   :  { %v232_v19 = vsub.f32 %v220_v14, %v1996_v15 }
  0x95   :  { %v319_v23 = vmul.f32 %v1999_v16, %v232_v19 }
  0x97   :  { %v258_v55 = vpop.f32.mrf.mxu0  ;;  %v322_v28 = vmul.f32 %v319_v23, %v232_v19  ;;  %v1836_v23 = vld [vmem:[%s2084_s20] ss:$0 sm:$0xff]  ;;  %s1573_s20 = sld [smem:[%s2452_s0 + %s1913_s17]]  }
  0x98   :  { %1603 = vmatmul.msk.f32.gmra.mxu2 %vm403_vm6, %v402_v52  ;;  %s1571_s17 = sld [smem:[%s2452_s0 + %s1918_s14]]   ;;  %s1925_s14 = smov 29  }
  0x99   :  { %v325_v33 = vmul.f32 1.442695, %v322_v28 }
  0x9a   :  { %v312_v49 = vpop.f32.mrf.mxu1 }
  0xcd   :  { %v276_v54 = vpop.permute.xlu2 %275 }
  0xce   :  { %v2055_v56 = vsel %vm281_vm9, %v256_v53, %v276_v54 }
  0xd5   :  { %v225_v8 = vpop.permute.xlu2 %224 }
  0xd6   :  { %v233_v11 = vsub.f32 %v225_v8, %v1996_v15 }
  0xd8   :  { %v320_v17 = vmul.f32 %v1999_v16, %v233_v11 }
  0xda   :  { %v323_v20 = vmul.f32 %v320_v17, %v233_v11 }
  0xdc   :  { %v327_v26 = vmul.f32 1.442695, %v323_v20 }
  0xde   :  { %1857 = vpow2.f32 %v327_v26 }
  0xdf   :  { %1859 = vpow2.f32 %v325_v33 }
  0xed   :  { %v278_v57 = vpop.permute.xlu0 %277 }
  0xee   :  { %v2058_v58 = vsel %vm281_vm9, %v258_v55, %v278_v57  ;;  %v2138_v55 = vpop.f32.mrf.mxu1 }
  0xef   :  { %v2062_v60 = vpack.c.bf16 %v2058_v58, %v2055_v56 }
  0xf1   :  { %530 = vmatpush.bf16.msra.mxu3 %v2062_v60 }
  0xf4   :  { %1604 = vmatmul.msk.bf16.vlgmr.msra.gmra.mxu3 %vm403_vm6, %v2020_v39 }
  0xf5   :  { %v230_v21 = vpop.permute.xlu0 %229 }
  0xf6   :  { %v234_v24 = vsub.f32 %v230_v21, %v1996_v15  ;;  %v1858_v15 = vpop.eup %1857  ;;  %v317_v4 = vpop.f32.mrf.mxu1 }
  0xf7   :  { %v1860_v38 = vpop.eup %1859 }
  0xf8   :  { %v321_v29 = vmul.f32 %v1999_v16, %v234_v24  ;;  %v2120_v16 = vmul.f32 0.01, %v2023_v40  ;;  %v1751_v40 = vld [vmem:[%s1564_s6] sm:$0xff] }
  0xf9   :  { %615 = vmatpush.bf16.msrb.mxu2 %v1751_v40 }
  0xfa   :  { %v324_v34 = vmul.f32 %v321_v29, %v234_v24  ;;  %v1837_v29 = vld [vmem:[%s2097_s28] ss:$0 sm:$0xff] }
  0xfc   :  { %v329_v35 = vmul.f32 1.442695, %v324_v34 }
  0xfe   :  { %1861 = vpow2.f32 %v329_v35 }
 0x104   :  { %1605 = vmatmul.msk.bf16.gmra.mxu3 %vm403_vm6, %v2068_v1  ;;  %v1862_v41 = vpop.eup %1861 }
 0x10b   :  { %v2073_v5 = vpop.f32.mrf.mxu2 }
 0x10c   :  { %v439_v7 = vmul.f32 %v2073_v5, %v2073_v5 }
 0x10e   :  { %v443_v10 = vsel %vm442_vm12, %v439_v7, 0.0 }
 0x10f   :  { %444 = vadd.xlane.f32.xlu1 %v443_v10 }
 0x113   :  { %v2079_v12 = vpop.f32.mrf.mxu2 }
 0x114   :  { %v440_v13 = vmul.f32 %v2079_v12, %v2079_v12 }
 0x116   :  { %v446_v18 = vsel %vm442_vm12, %v440_v13, 0.0 }
 0x117   :  { %447 = vadd.xlane.f32.xlu2 %v446_v18 }
 0x11b   :  { %v2101_v22 = vpop.f32.mrf.mxu2 }
 0x11c   :  { %v441_v25 = vmul.f32 %v2101_v22, %v2101_v22 }
 0x11e   :  { %v449_v27 = vsel %vm442_vm12, %v441_v25, 0.0 }
 0x11f   :  { %450 = vadd.xlane.f32.xlu0 %v449_v27 }
 0x128   :  { %336 = vrot.lane.b32.xlu1 %v1858_v15, %s1902_s8 }
 0x12f   :  { %334 = vrot.lane.b32.xlu2 %v1860_v38, %s1902_s8 }
 0x130   :  { %771 = vperm.xlu1 %1830, %v347_v37  }
 0x133   :  { %338 = vrot.lane.b32.xlu0 %v1862_v41, %s1902_s8  ;;  %s1920_s8 = smov 25  }
 0x137   :  { %766 = vperm.xlu2 %1831, %v346_v42  }
 0x138   :  { %1043 = vperm.xlu1 %1830, %v2120_v16  }
 0x13b   :  { %1033 = vperm.xlu0 %1829, %v2123_v45  }
 0x13f   :  { %1038 = vperm.xlu2 %1831, %v2127_v6  }
 0x177   :  { %v532_v47 = vpop.f32.mrf.mxu3 }
 0x17f   :  { %v534_v51 = vpop.f32.mrf.mxu3 }
 0x180   :  { %v545_v52 = vpack.c.bf16 %v534_v51, %v532_v47 }
 0x182   :  { %v445_v53 = vpop.xlane.xlu1 %444  ;;  %1624 = vmatmul.msk.bf16.vlgmr.msrb.gmra.mxu2 %vm565_vm13, %v545_v52 }
 0x183   :  { %v452_v54 = vadd.f32 1e-12, %v445_v53 }
 0x185   :  { %1863 = vrsqrt.f32 %v452_v54  ;;  %vm462_vm14 = vcmp.eq.f32.partialorder %v452_v54, inf  ;;  %v465_v24 = vand.u32 2147483648, %v452_v54  ;;  %vm464_vm15 = vcmp.eq.f32.partialorder %v452_v54, 0.0 }
 0x187   :  { %v537_v57 = vpop.f32.mrf.mxu3 }
 0x188   :  { %v546_v10 = vpack.c.bf16 %v537_v57, %v537_v57  ;;  %v1762_v57 = vld [vmem:[%s1573_s20] sm:$0xff] }
 0x189   :  { %853 = vmatpush.bf16.msra.mxu1 %v1762_v57 }
 0x18a   :  { %v448_v59 = vpop.xlane.xlu2 %447 }
 0x18b   :  { %v1864_v61 = vpop.eup %1863  ;;  %v453_v62 = vadd.f32 1e-12, %v448_v59 }
 0x18c   :  { %v456_v63 = vmul.f32 %v1864_v61, %v452_v54 }
 0x18d   :  { %1865 = vrsqrt.f32 %v453_v62  ;;  %vm474_vm2 = vcmp.eq.f32.partialorder %v453_v62, inf  ;;  %v477_v47 = vand.u32 2147483648, %v453_v62  ;;  %vm476_vm3 = vcmp.eq.f32.partialorder %v453_v62, 0.0 }
 0x18e   :  { %v457_v0 = vmul.f32 %v1864_v61, %v456_v63 }
 0x18f   :  { %v539_v8 = vpop.f32.mrf.mxu3 }
 0x190   :  { %v458_v7 = vmul.f32 0.5, %v457_v0 }
 0x192   :  { %v459_v11 = vsub.f32 1.5, %v458_v7  ;;  %v451_v13 = vpop.xlane.xlu0 %450  ;;  %1625 = vmatmul.msk.bf16.gmra.mxu2 %vm565_vm13, %v546_v10  ;;  %v335_v26 = vpop.permute.xlu2 %334 }
 0x193   :  { %v1866_v14 = vpop.eup %1865  ;;  %v454_v17 = vadd.f32 1e-12, %v451_v13  ;;  %v2150_v37 = vsel %vm281_vm9, %v310_v9, %v335_v26 }
 0x194   :  { %v460_v18 = vmul.f32 %v1864_v61, %v459_v11  ;;  %v468_v19 = vmul.f32 %v1866_v14, %v453_v62 }
 0x195   :  { %1867 = vrsqrt.f32 %v454_v17  ;;  %vm486_vm4 = vcmp.eq.f32.partialorder %v454_v17, inf  ;;  %v489_v7 = vand.u32 2147483648, %v454_v17  ;;  %vm488_vm5 = vcmp.eq.f32.partialorder %v454_v17, 0.0 }
 0x196   :  { %v461_v20 = vmul.f32 %v460_v18, %v452_v54  ;;  %v469_v21 = vmul.f32 %v1866_v14, %v468_v19 }
 0x198   :  { %v470_v25 = vmul.f32 0.5, %v469_v21  ;;  %v463_v27 = vsel %vm462_vm14, %v452_v54, %v461_v20 }
 0x199   :  { %v2145_v28 = vsel %vm464_vm15, %v465_v24, %v463_v27 }
 0x19a   :  { %v471_v33 = vsub.f32 1.5, %v470_v25  ;;  %v337_v34 = vpop.permute.xlu1 %336  ;;  %v495_v15 = vsub.f32 %v2145_v28, %v1836_v23 }
 0x19b   :  { %v1868_v35 = vpop.eup %1867  ;;  %v2153_v38 = vsel %vm281_vm9, %v312_v49, %v337_v34 }
 0x19c   :  { %v472_v41 = vmul.f32 %v1866_v14, %v471_v33  ;;  %v2160_v42 = vpack.c.bf16 %v2153_v38, %v2150_v37  ;;  %v480_v3 = vmul.f32 %v1868_v35, %v454_v17  ;;  %v502_v40 = vmul.f32 %v1837_v29, %v495_v15 }
 0x19e   :  { %v473_v32 = vmul.f32 %v472_v41, %v453_v62  ;;  %1614 = vmatmul.msk.bf16.vlgmr.msrb.gmra.mxu0 %vm565_vm13, %v2160_v42  ;;  %v481_v9 = vmul.f32 %v1868_v35, %v480_v3  ;;  %v505_v52 = vmul.f32 %v502_v40, %v495_v15 }
 0x1a0   :  { %v475_v48 = vsel %vm474_vm2, %v453_v62, %v473_v32  ;;  %v482_v49 = vmul.f32 0.5, %v481_v9  ;;  %v508_v63 = vmul.f32 1.442695, %v505_v52  ;;  %v2193_v9 = vshrl.u32 %v351_v30, 7  ;;  %v1838_v52 = vld [vmem:[%s2181_s25] ss:$0 sm:$0xff]  ;;  %s1575_s25 = sld [smem:[%s2452_s0 + %s1920_s8]]  }
 0x1a1   :  { %v2164_v51 = vsel %vm476_vm3, %v477_v47, %v475_v48  ;;  %s1927_s8 = smov 31  }
 0x1a2   :  { %v496_v53 = vsub.f32 %v2164_v51, %v1836_v23  ;;  %v483_v54 = vsub.f32 1.5, %v482_v49  ;;  %1869 = vpow2.f32 %v508_v63 }
 0x1a4   :  { %v503_v59 = vmul.f32 %v1837_v29, %v496_v53  ;;  %v484_v61 = vmul.f32 %v1868_v35, %v483_v54 }
 0x1a5   :  { %v339_v0 = vpop.permute.xlu0 %338 }
 0x1a6   :  { %v506_v2 = vmul.f32 %v503_v59, %v496_v53  ;;  %v485_v4 = vmul.f32 %v484_v61, %v454_v17  ;;  %v2169_v62 = vsel %vm281_vm9, %v2138_v55, %v339_v0  ;;  %v2197_v59 = vadd.s32 8, %v2193_v9  ;;  %v1839_v61 = vld [vmem:[%s1557_s29] ss:$0 sm:$0xff]  ;;  %s1922_s29 = smov 34  }
 0x1a7   :  { %v2176_v14 = vpack.c.bf16 %v2169_v62, %v2169_v62  ;;  %vm394_vm7 = vcmp.eq.s32.totalorder %v2193_v9, %v1839_v61  ;;  %s2262_s3 = sld [smem:[%s2452_s0 + %s1922_s29]]  }
 0x1a8   :  { %v510_v8 = vmul.f32 1.442695, %v506_v2  ;;  %v487_v10 = vsel %vm486_vm4, %v454_v17, %v485_v4  ;;  %v1870_v55 = vpop.eup %1869  ;;  %vm395_vm8 = vcmp.eq.s32.totalorder %v2197_v59, %v1839_v61  ;;  %v767_v61 = vpop.permute.xlu2 %766  ;;  %vm1363_vm14 = vcmp.eq.s32.totalorder %v2009_v31, %v2197_v59  ;;  %s1587_s29 = sld [smem:[%s2452_s0 + %s1937_s27]]  }
 0x1a9   :  { %v2171_v11 = vsel %vm488_vm5, %v489_v7, %v487_v10 }
 0x1aa   :  { %1871 = vpow2.f32 %v510_v8  ;;  %v497_v13 = vsub.f32 %v2171_v11, %v1836_v23 }
 0x1ac   :  { %v504_v18 = vmul.f32 %v1837_v29, %v497_v13 }
 0x1ae   :  { %1615 = vmatmul.msk.bf16.gmra.mxu0 %vm565_vm13, %v2176_v14  ;;  %v507_v19 = vmul.f32 %v504_v18, %v497_v13  ;;  %v2209_v13 = vsel %vm394_vm7, 1.0, %v1903_v36  ;;  %v2212_v18 = vsel %vm395_vm8, 1.0, %v1903_v36 }
 0x1b0   :  { %v1872_v17 = vpop.eup %1871  ;;  %v512_v21 = vmul.f32 1.442695, %v507_v19  ;;  %v673_v19 = vpack.c.bf16 %v2212_v18, %v2209_v13 }
 0x1b1   :  { %v628_v20 = vpack.c.bf16 %v1872_v17, %v1870_v55  ;;  %v1757_v55 = vld [vmem:[%s1568_s4 + $0x8] sm:$0xff] }
 0x1b2   :  { %1873 = vpow2.f32 %v512_v21 }
 0x1b3   :  { %1630 = vmatmul.msk.bf16.vlgmr.msrb.gmra.mxu1 %vm403_vm6, %v628_v20 }
 0x1b8   :  { %v1874_v23 = vpop.eup %1873 }
 0x1b9   :  { %v629_v24 = vpack.c.bf16 %v1874_v23, %v1874_v23  ;;  %v1761_v23 = vld [vmem:[%s1572_s10 + $0x8] sm:$0xff] }
 0x1c3   :  { %1631 = vmatmul.msk.bf16.gmra.mxu1 %vm403_vm6, %v629_v24 }
 0x1d3   :  { %1659 = vmatmul.msk.bf16.vlgmr.msra.gmra.mxu1 %vm403_vm6, %v628_v20  ;;  %v1756_v20 = vld [vmem:[%s1568_s4] sm:$0xff]  ;;  %s1923_s4 = smov 27  }
 0x1d4   :  { %s1577_s9 = sld [smem:[%s2452_s0 + %s1923_s4]]  }
 0x1d5   :  { %s2423_s4 = sld [smem:[%s2452_s0 + %s1938_s30]]  }
 0x1e3   :  { %1660 = vmatmul.msk.bf16.gmra.mxu1 %vm403_vm6, %v629_v24  ;;  %v1760_v24 = vld [vmem:[%s1572_s10] sm:$0xff]  ;;  %s1924_s10 = smov 26  }
 0x205   :  { %v617_v25 = vpop.f32.mrf.mxu2 }
 0x20d   :  { %v619_v26 = vpop.f32.mrf.mxu2 }
 0x215   :  { %v622_v27 = vpop.f32.mrf.mxu2 }
 0x21b   :  { %v581_v29 = vpop.f32.mrf.mxu0 }
 0x21c   :  { %v618_v47 = vadd.f32 %v617_v25, %v581_v29  ;;  %v1758_v29 = vld [vmem:[%s1569_s21] sm:$0xff] }
 0x21d   :  { %v624_v33 = vpop.f32.mrf.mxu2 }
 0x223   :  { %v583_v34 = vpop.f32.mrf.mxu0 }
 0x224   :  { %v620_v40 = vadd.f32 %v619_v26, %v583_v34 }
 0x22b   :  { %v586_v15 = vpop.f32.mrf.mxu0 }
 0x22c   :  { %v623_v32 = vadd.f32 %v622_v27, %v586_v15 }
 0x230   :  { %v651_v35 = vpop.f32.mrf.mxu1 }
 0x231   :  { %v660_v54 = vadd.f32 %v651_v35, %v618_v47 }
 0x233   :  { %v588_v41 = vpop.f32.mrf.mxu0  ;;  %v667_v30 = vadd.f32 %v1838_v52, %v660_v54 }
 0x235   :  { %v670_v10 = vmax.f32 %v667_v30, 0.0  ;;  %v772_v30 = vpop.permute.xlu1 %771 }
 0x238   :  { %v653_v3 = vpop.f32.mrf.mxu1 }
 0x239   :  { %v661_v48 = vadd.f32 %v653_v3, %v620_v40  ;;  %v1840_v3 = vld [vmem:[%s1574_s13] ss:$0 sm:$0xff]  ;;  %s1576_s13 = sld [smem:[%s2452_s0 + %s1924_s10]]  }
 0x23a   :  { %s2429_s10 = sld [smem:[%s2452_s0 + %s1939_s5]]  }
 0x23b   :  { %v668_v63 = vadd.f32 %v1838_v52, %v661_v48 }
 0x23d   :  { %v671_v4 = vmax.f32 %v668_v63, 0.0 }
 0x23f   :  { %v674_v17 = vpack.c.bf16 %v671_v4, %v670_v10  ;;  %v1841_v4 = vld [vmem:[%s1571_s17] ss:$0 sm:$0xff]  ;;  %s2276_s17 = sld [smem:[%s2452_s0 + %s1925_s14]]  }
 0x240   :  { %v656_v49 = vpop.f32.mrf.mxu1  ;;  %s1593_s14 = sld [smem:[%s2452_s0 + %s1940_s11]]  }
 0x241   :  { %v662_v53 = vadd.f32 %v656_v49, %v623_v32 }
 0x243   :  { %v669_v57 = vadd.f32 %v1838_v52, %v662_v53 }
 0x245   :  { %v672_v0 = vmax.f32 %v669_v57, 0.0  ;;  %v1834_v57 = vld [vmem:[%s2091_s24] ss:$0 sm:$0xff]  ;;  %s1921_s24 = smov 33  }
 0x246   :  { %s1583_s28 = sld [smem:[%s2452_s0 + %s1921_s24]]   ;;  %s1928_s24 = smov 32  }
 0x247   :  { %v675_v2 = vpack.c.bf16 %v672_v0, %v672_v0  ;;  %v777_v0 = vmul.f32 %v1834_v57, %v767_v61 }
 0x248   :  { %v658_v7 = vpop.f32.mrf.mxu1 }
 0x249   :  { %v680_v8 = vsel %vm243_vm0, %v675_v2, 0  ;;  %vm1362_vm0 = vcmp.eq.s32.totalorder %v2009_v31, %v2193_v9 }
 0x24a   :  { %688 = vmatpush.bf16.msrb.mxu3 %v680_v8  ;;  %v778_v8 = vmul.f32 %v1834_v57, %v772_v30  ;;  %v1034_v30 = vpop.permute.xlu0 %1033 }
 0x24e   :  { %689 = vmatpush.bf16.msrb.mxu3 %v674_v17 }
 0x250   :  { %v855_v21 = vpop.f32.mrf.mxu1 }
 0x251   :  { %1632 = vmatmul.msk.bf16.vlgmr.msrb.gmra.mxu3 %vm281_vm9, %v673_v19 }
 0x252   :  { %755 = vmatpush.bf16.msra.mxu3 %v1757_v55 }
 0x256   :  { %756 = vmatpush.bf16.msra.mxu3 %v1756_v20 }
 0x258   :  { %v857_v25 = vpop.f32.mrf.mxu1 }
 0x25a   :  { %882 = vmatpush.bf16.msrb.mxu3 %v1761_v23  ;;  %v1764_v23 = vld [vmem:[%s1575_s25 + $0x8] sm:$0xff] }
 0x25e   :  { %883 = vmatpush.bf16.msrb.mxu3 %v1760_v24 }
 0x260   :  { %v2217_v26 = vpop.f32.mrf.mxu1 }
 0x261   :  { %1650 = vmatmul.msk.bf16.vlgmr.msra.gmra.mxu3 %vm565_vm13, %v2062_v60  ;;  %v1759_v60 = vld [vmem:[%s1569_s21 + $0x8] sm:$0xff]  ;;  %s1580_s21 = sld [smem:[%s2452_s0 + %s1926_s18]]  }
 0x262   :  { %726 = vmatpush.bf16.msra.mxu0 %v1759_v60  ;;  %s1595_s18 = sld [smem:[%s2452_s0 + %s1941_s15]]  }
 0x266   :  { %727 = vmatpush.bf16.msra.mxu0 %v1758_v29 }
 0x268   :  { %v862_v27 = vpop.f32.mrf.mxu1 }
 0x269   :  { %v1765_v27 = vld [vmem:[%s1576_s13] sm:$0xff] }
 0x271   :  { %1669 = vmatmul.msk.bf16.vlgmr.msrb.gmra.mxu3 %vm565_vm13, %v2160_v42 }
 0x281   :  { %1670 = vmatmul.msk.bf16.gmra.mxu3 %vm565_vm13, %v2176_v14 }
 0x2d4   :  { %v691_v33 = vpop.f32.mrf.mxu3 }
 0x2dc   :  { %v693_v34 = vpop.f32.mrf.mxu3 }
 0x2dd   :  { %v704_v42 = vpack.c.bf16 %v693_v34, %v691_v33 }
 0x2df   :  { %1641 = vmatmul.msk.bf16.vlgmr.msra.gmra.mxu0 %vm565_vm13, %v704_v42 }
 0x2e4   :  { %v758_v14 = vpop.f32.mrf.mxu3 }
 0x2ec   :  { %v760_v15 = vpop.f32.mrf.mxu3 }
 0x2f4   :  { %v885_v35 = vpop.f32.mrf.mxu3 }
 0x2f5   :  { %v886_v41 = vadd.f32 %v885_v35, %v855_v21 }
 0x2f7   :  { %v898_v47 = vadd.f32 %v1840_v3, %v886_v41 }
 0x2fc   :  { %v887_v40 = vpop.f32.mrf.mxu3 }
 0x2fd   :  { %v888_v32 = vadd.f32 %v887_v40, %v857_v25  ;;  %v1763_v25 = vld [vmem:[%s1575_s25] sm:$0xff]  ;;  %s1581_s25 = sld [smem:[%s2452_s0 + %s1927_s8]]  }
 0x2ff   :  { %v899_v48 = vadd.f32 %v1840_v3, %v888_v32 }
 0x301   :  { %v905_v49 = vpack.c.bf16 %v899_v48, %v898_v47 }
 0x304   :  { %v890_v52 = vpop.f32.mrf.mxu3 }
 0x305   :  { %v891_v43 = vadd.f32 %v890_v52, %v2217_v26  ;;  %v1766_v26 = vld [vmem:[%s1576_s13 + $0x8] sm:$0xff]  ;;  %s1933_s13 = smov 36  }
 0x306   :  { %s2362_s16 = sld [smem:[%s2452_s0 + %s1933_s13]]  }
 0x307   :  { %v900_v44 = vadd.f32 %v1840_v3, %v891_v43 }
 0x30c   :  { %v892_v53 = vpop.f32.mrf.mxu3 }
 0x30d   :  { %v1770_v53 = vld [vmem:[%s1580_s21 + $0x8] sm:$0xff] }
 0x30e   :  { %1102 = vmatpush.bf16.msra.mxu3 %v1770_v53 }
 0x35c   :  { %v729_v54 = vpop.f32.mrf.mxu0 }
 0x35d   :  { %v759_v63 = vadd.f32 %v758_v14, %v729_v54  ;;  %v1769_v54 = vld [vmem:[%s1580_s21] sm:$0xff]  ;;  %s1597_s21 = sld [smem:[%s2452_s0 + %s1942_s19]]  }
 0x35e   :  { %1103 = vmatpush.bf16.msra.mxu3 %v1769_v54 }
 0x35f   :  { %v779_v2 = vadd.f32 %v777_v0, %v759_v63 }
 0x361   :  { %v785_v55 = vadd.f32 %v1841_v4, %v779_v2 }
 0x363   :  { %v787_v20 = vadd.f32 %v785_v55, %v2055_v56  ;;  %v809_v56 = vpack.c.bf16 %v2043_v50, %v2043_v50  ;;  %v1768_v50 = vld [vmem:[%s1577_s9 + $0x8] sm:$0xff] }
 0x364   :  { %v731_v7 = vpop.f32.mrf.mxu0  ;;  %1015 = vmatpush.bf16.msrb.mxu1 %v1768_v50 }
 0x365   :  { %v761_v10 = vadd.f32 %v760_v15, %v731_v7 }
 0x367   :  { %v780_v17 = vadd.f32 %v778_v8, %v761_v10  ;;  %v101_v8 = vstv %s1581_s25 }
 0x368   :  { %102 = vst [vmem:[#allocation2] sm:$0x1] %v101_v8 }
 0x369   :  { %v786_v19 = vadd.f32 %v1841_v4, %v780_v17  ;;  %v1835_v4 = vld [vmem:[%s2110_s2] ss:$0 sm:$0xff]  ;;  %v1039_v17 = vpop.permute.xlu2 %1038  ;;  %s1929_s2 = smov 39  }
 0x36a   :  { %v1049_v55 = vmul.f32 %v1835_v4, %v1034_v30  ;;  %s2332_s1 = sld [smem:[%s2452_s0 + %s1929_s2]]  }
 0x36b   :  { %v788_v21 = vadd.f32 %v786_v19, %v2058_v58  ;;  %v1771_v58 = vld [vmem:[%s1583_s28] sm:$0xff] }
 0x36d   :  { %v789_v24 = vpack.c.bf16 %v788_v21, %v787_v20  ;;  %v1843_v21 = vld [vmem:[%s2276_s17] ss:$0 sm:$0xff]  ;;  %s1934_s17 = smov 46  }
 0x36e   :  { %s1596_s20 = sld [smem:[%s2452_s0 + %s1934_s17]]  }
 0x36f   :  { %797 = vmatpush.bf16.msra.mxu2 %v789_v24  ;;  %823 = vmatpush.bf16.msrb.mxu0 %v789_v24 }
 0x372   :  { %1651 = vmatmul.msk.bf16.vlgmr.msra.gmra.mxu2 %vm403_vm6, %v2020_v39  ;;  %1653 = vmatmul.msk.bf16.vlgmr.msrb.gmra.mxu0 %vm403_vm6, %v808_v46  ;;  %v1772_v39 = vld [vmem:[%s1583_s28 + $0x8] sm:$0xff]  ;;  %v906_v46 = vpack.c.bf16 %v900_v44, %v900_v44  ;;  %s1582_s28 = sld [smem:[%s2452_s0 + %s1928_s24]]   ;;  %v1044_v44 = vpop.permute.xlu1 %1043 }
 0x373   :  { %973 = vmatpush.bf16.msra.mxu0 %v1764_v23  ;;  %937 = vmatpush.bf16.msrb.mxu2 %v1766_v26 }
 0x377   :  { %974 = vmatpush.bf16.msra.mxu0 %v1763_v25  ;;  %938 = vmatpush.bf16.msrb.mxu2 %v1765_v27  ;;  %v1051_v27 = vmul.f32 %v1835_v4, %v1044_v44 }
 0x378   :  { %v103_v10 = vstv %s1582_s28 }
 0x379   :  { %104 = vst [vmem:[#allocation3] sm:$0x1] %v103_v10 }
 0x37b   :  { %1256 = vmatpush.bf16.msrb.mxu0 %v1772_v39 }
 0x37f   :  { %1257 = vmatpush.bf16.msrb.mxu0 %v1771_v58 }
 0x382   :  { %1652 = vmatmul.msk.bf16.gmra.mxu2 %vm403_vm6, %v2068_v1  ;;  %1654 = vmatmul.msk.bf16.gmra.mxu0 %vm403_vm6, %v809_v56  ;;  %v1767_v1 = vld [vmem:[%s1577_s9] sm:$0xff]  ;;  %s1932_s9 = smov 35  }
 0x383   :  { %1016 = vmatpush.bf16.msrb.mxu1 %v1767_v1  ;;  %s2357_s12 = sld [smem:[%s2452_s0 + %s1932_s9]]  }
 0x392   :  { %1689 = vmatmul.msk.bf16.vlgmr.msra.gmra.mxu0 %vm565_vm13, %v905_v49 }
 0x3a2   :  { %1690 = vmatmul.msk.bf16.gmra.mxu0 %vm565_vm13, %v906_v46 }
 0x3b2   :  { %1721 = vmatmul.msk.bf16.vlgmr.msrb.gmra.mxu0 %vm565_vm13, %v789_v24  ;;  %v1050_v24 = vmul.f32 %v1835_v4, %v1039_v17  ;;  %v1140_v4 = vadd.f32 1.0, %v2164_v51 }
 0x3b4   :  { %vm1162_vm7 = vweird.f32 %v1140_v4 }
 0x3ef   :  { %v825_v60 = vpop.f32.mrf.mxu0 }
 0x3f5   :  { %v799_v29 = vpop.f32.mrf.mxu2 }
 0x3f7   :  { %v827_v33 = vpop.f32.mrf.mxu0 }
 0x3f8   :  { %v989_v34 = vpack.c.bf16 %v827_v33, %v825_v60 }
 0x3fa   :  { %1699 = vmatmul.msk.bf16.vlgmr.msrb.gmra.mxu1 %vm565_vm13, %v989_v34 }
 0x3fd   :  { %v801_v42 = vpop.f32.mrf.mxu2 }
 0x3fe   :  { %v911_v14 = vpack.c.bf16 %v801_v42, %v799_v29 }
 0x3ff   :  { %v830_v15 = vpop.f32.mrf.mxu0 }
 0x400   :  { %1679 = vmatmul.msk.bf16.vlgmr.msrb.gmra.mxu2 %vm565_vm13, %v911_v14  ;;  %v990_v3 = vpack.c.bf16 %v830_v15, %v830_v15 }
 0x405   :  { %v804_v35 = vpop.f32.mrf.mxu2 }
 0x406   :  { %v912_v32 = vpack.c.bf16 %v804_v35, %v804_v35 }
 0x407   :  { %v832_v41 = vpop.f32.mrf.mxu0 }
 0x40a   :  { %1700 = vmatmul.msk.bf16.gmra.mxu1 %vm565_vm13, %v990_v3  ;;  %v1845_v3 = vld [vmem:[#allocation3] ss:$0 sm:$0xff] }
 0x40d   :  { %v806_v40 = vpop.f32.mrf.mxu2 }
 0x40f   :  { %v976_v47 = vpop.f32.mrf.mxu0 }
 0x410   :  { %1680 = vmatmul.msk.bf16.gmra.mxu2 %vm565_vm13, %v912_v32 }
 0x417   :  { %v978_v48 = vpop.f32.mrf.mxu0 }
 0x41f   :  { %v981_v49 = vpop.f32.mrf.mxu0 }
 0x427   :  { %v983_v52 = vpop.f32.mrf.mxu0 }
 0x477   :  { %v1018_v57 = vpop.f32.mrf.mxu1 }
 0x47f   :  { %v1020_v61 = vpop.f32.mrf.mxu1 }
 0x483   :  { %v940_v63 = vpop.f32.mrf.mxu2 }
 0x484   :  { %v977_v0 = vadd.f32 %v976_v47, %v940_v63  ;;  %v1842_v63 = vld [vmem:[%s2262_s3] ss:$0 sm:$0xff]  ;;  %s1931_s3 = smov 40  }
 0x485   :  { %s1590_s6 = sld [smem:[%s2452_s0 + %s1931_s3]]  }
 0x486   :  { %v1027_v7 = vadd.f32 %v1018_v57, %v977_v0 }
 0x487   :  { %v1023_v2 = vpop.f32.mrf.mxu1 }
 0x488   :  { %v1052_v20 = vadd.f32 %v1049_v55, %v1027_v7  ;;  %v1139_v7 = vadd.f32 1.0, %v2145_v28 }
 0x48a   :  { %v1059_v39 = vadd.f32 %v1843_v21, %v1052_v20 }
 0x48b   :  { %v942_v19 = vpop.f32.mrf.mxu2 }
 0x48c   :  { %v979_v23 = vadd.f32 %v978_v48, %v942_v19  ;;  %v1062_v50 = vadd.f32 %v1059_v39, %v2150_v37  ;;  %v1364_v37 = vadd.s32 12, %v2193_v9  ;;  %v1844_v9 = vld [vmem:[#allocation2] ss:$0 sm:$0xff] }
 0x48d   :  { %v1075_v41 = vmul.f32 %v1844_v9, %v2123_v45  ;;  %v1076_v48 = vmul.f32 %v1844_v9, %v2127_v6  ;;  %v1259_v45 = vpop.f32.mrf.mxu0 }
 0x48e   :  { %v1028_v25 = vadd.f32 %v1020_v61, %v979_v23  ;;  %vm1366_vm6 = vcmp.eq.s32.totalorder %v2009_v31, %v1364_v37  ;;  %v2316_v6 = vadd.f32 %v1842_v63, %v1259_v45 }
 0x48f   :  { %v1025_v56 = vpop.f32.mrf.mxu1  ;;  %vm1368_vm10 = vmor %vm1362_vm0, %vm1366_vm6 }
 0x490   :  { %v1053_v58 = vadd.f32 %v1050_v24, %v1028_v25 }
 0x492   :  { %v1060_v43 = vadd.f32 %v1843_v21, %v1053_v58 }
 0x493   :  { %v945_v46 = vpop.f32.mrf.mxu2 }
 0x494   :  { %v1063_v1 = vadd.f32 %v1060_v43, %v2153_v38  ;;  %v982_v26 = vadd.f32 %v981_v49, %v945_v46  ;;  %v1370_v38 = vsel %vm1368_vm10, 1.0, %v1903_v36  ;;  %v1168_v43 = vand.u32 2147483648, %v1140_v4 }
 0x495   :  { %v1261_v61 = vpop.f32.mrf.mxu0  ;;  %vm1147_vm10 = vweird.f32 %v1139_v7 }
 0x496   :  { %v1069_v60 = vpack.c.bf16 %v1063_v1, %v1062_v50  ;;  %v1029_v29 = vadd.f32 %v1023_v2, %v982_v26  ;;  %v2312_v0 = vadd.f32 %v1842_v63, %v1261_v61  ;;  %v1264_v2 = vsel %vm565_vm13, %v2316_v6, 0.0 }
 0x498   :  { %v1054_v33 = vadd.f32 %v1051_v27, %v1029_v29  ;;  %1709 = vmatmul.msk.bf16.vlgmr.msra.gmra.mxu3 %vm565_vm13, %v1069_v60  ;;  %v1267_v30 = vsel %vm565_vm13, %v2312_v0, 0.0  ;;  %v1151_v60 = vand.u32 2147483647, %v1139_v7  ;;  %v1153_v29 = vand.u32 2147483648, %v1139_v7 }
 0x49a   :  { %v1061_v34 = vadd.f32 %v1843_v21, %v1054_v33 }
 0x49b   :  { %v947_v42 = vpop.f32.mrf.mxu2 }
 0x49c   :  { %v1064_v14 = vadd.f32 %v1061_v34, %v2169_v62  ;;  %v1365_v62 = vadd.s32 12, %v2197_v59 }
 0x49e   :  { %1391 = vmatpush.msrb.mxu3 %v1064_v14  ;;  %v1070_v15 = vpack.c.bf16 %v1064_v14, %v1064_v14  ;;  %vm1367_vm15 = vcmp.eq.s32.totalorder %v2009_v31, %v1365_v62  ;;  %v1077_v31 = vmul.f32 %v1844_v9, %v2120_v16  ;;  %v1141_v16 = vadd.f32 1.0, %v2171_v11 }
 0x49f   :  { %vm1369_vm2 = vmor %vm1363_vm14, %vm1367_vm15 }
 0x4a0   :  { %1392 = vmatpush.msrb.mxu3 %v1063_v1  ;;  %v1371_v35 = vsel %vm1369_vm2, 1.0, %v1903_v36  ;;  %1875 = vrcp.f32 %v1141_v16  ;;  %v1183_v51 = vand.u32 2147483648, %v1141_v16  ;;  %vm1177_vm5 = vweird.f32 %v1141_v16 }
 0x4a1   :  { %1877 = vrcp.f32 %v1140_v4  ;;  %v1181_v28 = vand.u32 2147483647, %v1141_v16 }
 0x4a2   :  { %1393 = vmatpush.msrb.mxu3 %v1062_v50  ;;  %1879 = vrcp.f32 %v1139_v7  ;;  %v1166_v50 = vand.u32 2147483647, %v1140_v4  ;;  %v1184_v34 = vor.u32 1.1754944e-38, %v1183_v51 }
 0x4a3   :  { %vm1182_vm14 = vcmp.eq.f32.partialorder %v1181_v28, 8.507059e+37 }
 0x4a4   :  { %vm1167_vm2 = vcmp.eq.f32.partialorder %v1166_v50, 8.507059e+37  ;;  %v1774_v50 = vld [vmem:[%s1587_s29 + $0x8] sm:$0xff] }
 0x4a5   :  { %1352 = vmatpush.bf16.msra.mxu1 %v1774_v50 }
 0x4a6   :  { %v1876_v8 = vpop.eup %1875 }
 0x4a7   :  { %v1878_v10 = vpop.eup %1877  ;;  %v1173_v55 = vmul.f32 %v1876_v8, %v1141_v16  ;;  %vm1178_vm3 = vweird.f32 %v1876_v8  ;;  %v1891_v16 = vld [vmem:[%s1993_s7] sm:$0xff] }
 0x4a8   :  { %1710 = vmatmul.msk.bf16.gmra.mxu3 %vm565_vm13, %v1070_v15  ;;  %v1880_v17 = vpop.eup %1879  ;;  %v1158_v19 = vmul.f32 %v1878_v10, %v1140_v4  ;;  %vm1163_vm4 = vweird.f32 %v1878_v10  ;;  %vm2323_vm8 = vmor %vm1177_vm5, %vm1178_vm3  ;;  %vm1152_vm3 = vcmp.eq.f32.partialorder %v1151_v60, 8.507059e+37 }
 0x4a9   :  { %v1143_v20 = vmul.f32 %v1880_v17, %v1139_v7  ;;  %v1174_v21 = vsub.f32 1.0, %v1173_v55  ;;  %vm1148_vm0 = vweird.f32 %v1880_v17  ;;  %vm2334_vm6 = vmor %vm1162_vm7, %vm1163_vm4  ;;  %v1846_v55 = vld [vmem:[%s1590_s6] ss:$0 sm:$0xff]  ;;  %vm1449_vm4 = vcmask 257024  }
 0x4aa   :  { %v1159_v23 = vsub.f32 1.0, %v1158_v19  ;;  %vm1149_vm15 = vmor %vm1147_vm10, %vm1148_vm0 }
 0x4ab   :  { %v1144_v24 = vsub.f32 1.0, %v1143_v20  ;;  %v1175_v25 = vmul.f32 %v1876_v8, %v1174_v21 }
 0x4ac   :  { %v1160_v56 = vmul.f32 %v1878_v10, %v1159_v23 }
 0x4ad   :  { %v1145_v39 = vmul.f32 %v1880_v17, %v1144_v24  ;;  %v1176_v11 = vadd.f32 %v1876_v8, %v1175_v25 }
 0x4ae   :  { %v1161_v58 = vadd.f32 %v1878_v10, %v1160_v56 }
 0x4af   :  { %v1146_v1 = vadd.f32 %v1880_v17, %v1145_v39  ;;  %v1180_v26 = vsel %vm2323_vm8, %v1876_v8, %v1176_v11  ;;  %v1892_v8 = vld [vmem:[%s1993_s7 + $0x8] sm:$0xff]  ;;  %s1935_s7 = smov 41  }
 0x4b0   :  { %v1165_v14 = vsel %vm2334_vm6, %v1878_v10, %v1161_v58  ;;  %v1185_v62 = vsel %vm1182_vm14, %v1184_v34, %v1180_v26  ;;  %s2392_s22 = sld [smem:[%s2452_s0 + %s1935_s7]]   ;;  %v1773_v26 = vld [vmem:[%s1587_s29] sm:$0xff] }
 0x4b1   :  { %1353 = vmatpush.bf16.msra.mxu1 %v1773_v26 }
 0x4b8   :  { %1731 = vmatmul.msk.f32.vlgmr.msrb.gmra.mxu3 %vm281_vm9, %v1370_v38  ;;  %v1169_v38 = vor.u32 1.1754944e-38, %v1168_v43 }
 0x4c0   :  { %1732 = vmatmul.msk.f32.gmra.mxu3 %vm281_vm9, %v1371_v35  ;;  %v1150_v35 = vsel %vm1149_vm15, %v1880_v17, %v1146_v1 }
 0x51b   :  { %v1105_v40 = vpop.f32.mrf.mxu3 }
 0x51c   :  { %v1106_v32 = vadd.f32 %v1105_v40, %v1075_v41  ;;  %v1154_v40 = vor.u32 1.1754944e-38, %v1153_v29 }
 0x51e   :  { %v1118_v47 = vadd.f32 %v1845_v3, %v1106_v32 }
 0x520   :  { %1123 = vperm.xlu1 %1830, %v1118_v47  }
 0x523   :  { %v1107_v49 = vpop.f32.mrf.mxu3 }
 0x524   :  { %v1108_v59 = vadd.f32 %v1107_v49, %v1076_v48  ;;  %v1775_v49 = vld [vmem:[%s2332_s1] sm:$0xff] }
 0x526   :  { %v1119_v52 = vadd.f32 %v1845_v3, %v1108_v59 }
 0x528   :  { %1128 = vperm.xlu2 %1831, %v1119_v52  }
 0x52b   :  { %v1110_v36 = vpop.f32.mrf.mxu3 }
 0x52c   :  { %v1111_v53 = vadd.f32 %v1110_v36, %v1077_v31 }
 0x52e   :  { %v1120_v54 = vadd.f32 %v1845_v3, %v1111_v53  ;;  %v1170_v3 = vsel %vm1167_vm2, %v1169_v38, %v1165_v14 }
 0x530   :  { %1133 = vperm.xlu0 %1829, %v1120_v54  }
 0x533   :  { %v1112_v57 = vpop.f32.mrf.mxu3 }
 0x53b   :  { %v1395_v48 = vpop.f32.mrf.mxu3 }
 0x543   :  { %v1398_v59 = vpop.f32.mrf.mxu3 }
 0x544   :  { %v1413_v31 = vpack.c.bf16 %v1398_v59, %v1395_v48  ;;  %v1848_v59 = vld [vmem:[%s2362_s16] ss:$0 sm:$0xff] }
 0x551   :  { %1268 = vadd.xlane.f32.xlu2 %v1267_v30 }
 0x55a   :  { %1265 = vadd.xlane.f32.xlu0 %v1264_v2 }
 0x582   :  { %v1129_v44 = vpop.permute.xlu2 %1128 }
 0x583   :  { %v1137_v15 = vmul.f32 %v1129_v44, %v2079_v12  ;;  %v1155_v12 = vsel %vm1152_vm3, %v1154_v40, %v1150_v35 }
 0x585   :  { %v1171_v32 = vmul.f32 %v1170_v3, %v1137_v15 }
 0x592   :  { %v1124_v33 = vpop.permute.xlu1 %1123 }
 0x593   :  { %v1136_v9 = vmul.f32 %v1124_v33, %v2073_v5  ;;  %v1930_v5 = vmov 32.0  }
 0x594   :  { %1881 = vrcp.f32 %v1930_v5 }
 0x595   :  { %v1156_v47 = vmul.f32 %v1155_v12, %v1136_v9 }
 0x59a   :  { %v1882_v52 = vpop.eup %1881 }
 0x5a2   :  { %v1134_v42 = vpop.permute.xlu0 %1133 }
 0x5a3   :  { %v1138_v37 = vmul.f32 %v1134_v42, %v2101_v22  ;;  %v1776_v22 = vld [vmem:[%s2332_s1 + $0x8] sm:$0xff] }
 0x5a5   :  { %v1186_v41 = vmul.f32 %v1185_v62, %v1138_v37 }
 0x5a7   :  { %1206 = vmatpush.msra.mxu2 %v1186_v41 }
 0x5a9   :  { %1207 = vmatpush.msra.mxu2 %v1171_v32 }
 0x5ab   :  { %1208 = vmatpush.msra.mxu2 %v1156_v47 }
 0x5ac   :  { %1711 = vmatmul.msk.f32.vlgmr.msra.gmra.mxu2 %vm281_vm9, %v2209_v13  ;;  %v1271_v13 = vmul.f32 32.0, %v1882_v52 }
 0x5ad   :  { %1438 = vmatpush.bf16.msrb.mxu2 %v1776_v22  ;;  %v1847_v22 = vld [vmem:[%s2357_s12] ss:$0 sm:$0xff] }
 0x5ae   :  { %v1272_v36 = vsub.f32 1.0, %v1271_v13 }
 0x5b0   :  { %v1273_v53 = vmul.f32 %v1882_v52, %v1272_v36 }
 0x5b1   :  { %1439 = vmatpush.bf16.msrb.mxu2 %v1775_v49 }
 0x5b2   :  { %v1274_v54 = vadd.f32 %v1882_v52, %v1273_v53 }
 0x5b4   :  { %1712 = vmatmul.msk.f32.gmra.mxu2 %vm281_vm9, %v2212_v18  ;;  %vm1275_vm9 = vweird.f32 %v1882_v52 }
 0x5b5   :  { %v2364_v18 = vsel %vm1275_vm9, %v1882_v52, %v1274_v54 }
 0x5bc   :  { %1741 = vmatmul.msk.bf16.vlgmr.msrb.gmra.mxu2 %vm565_vm13, %v1413_v31 }
 0x5c4   :  { %v1269_v10 = vpop.xlane.xlu2 %1268 }
 0x5c5   :  { %v1278_v17 = vmul.f32 %v2364_v18, %v1269_v10 }
 0x5c7   :  { %v2382_v21 = vsub.f32 %v2312_v0, %v1278_v17 }
 0x5c9   :  { %v1282_v24 = vmul.f32 %v2382_v21, %v2382_v21 }
 0x5cb   :  { %v1286_v11 = vsel %vm565_vm13, %v1282_v24, 0.0 }
 0x5cd   :  { %v1266_v57 = vpop.xlane.xlu0 %1265 }
 0x5ce   :  { %v1277_v45 = vmul.f32 %v2364_v18, %v1266_v57 }
 0x5d0   :  { %v2368_v61 = vsub.f32 %v2316_v6, %v1277_v45 }
 0x5d2   :  { %v1281_v63 = vmul.f32 %v2368_v61, %v2368_v61 }
 0x5d4   :  { %v1283_v30 = vsel %vm565_vm13, %v1281_v63, 0.0 }
 0x5d5   :  { %1284 = vadd.xlane.f32.xlu2 %v1283_v30 }
 0x62f   :  { %v1210_v2 = vpop.f32.mrf.mxu2 }
 0x630   :  { %v1216_v4 = vadd.f32 %v1891_v16, %v1210_v2  ;;  %v1778_v2 = vld [vmem:[%s1593_s14 + $0x8] sm:$0xff] }
 0x631   :  { %1528 = vmatpush.bf16.msra.mxu0 %v1778_v2 }
 0x632   :  { %1218 = vst.msk [vmem:[%s1596_s20] sm:$0xff] %vm442_vm12, %v1216_v4  ;;  %v1777_v4 = vld [vmem:[%s1593_s14] sm:$0xff] }
 0x635   :  { %1529 = vmatpush.bf16.msra.mxu0 %v1777_v4 }
 0x637   :  { %v1213_v7 = vpop.f32.mrf.mxu2 }
 0x638   :  { %v1217_v6 = vadd.f32 %v1892_v8, %v1213_v7 }
 0x63a   :  { %1219 = vst.msk [vmem:[%s1596_s20 + $0x8] sm:$0xff] %vm442_vm12, %v1217_v6 }
 0x63f   :  { %v1441_v19 = vpop.f32.mrf.mxu2 }
 0x640   :  { %v1442_v20 = vadd.f32 %v1846_v55, %v1441_v19 }
 0x642   :  { %v1446_v23 = vsel %vm565_vm13, %v1442_v20, 0.0 }
 0x643   :  { %1447 = vadd.xlane.f32.xlu1 %v1446_v23 }
 0x647   :  { %v1443_v25 = vpop.f32.mrf.mxu2 }
 0x648   :  { %v1444_v56 = vadd.f32 %v1846_v55, %v1443_v25  ;;  %v1285_v0 = vpop.xlane.xlu2 %1284 }
 0x649   :  { %v1289_v51 = vmul.f32 %v1285_v0, %v2364_v18 }
 0x64a   :  { %v1450_v39 = vsel %vm1449_vm4, %v1444_v56, 0.0 }
 0x64b   :  { %1451 = vadd.xlane.f32.xlu0 %v1450_v39  ;;  %1287 = vadd.xlane.f32.xlu1 %v1286_v11  ;;  %v1291_v58 = vadd.f32 1e-05, %v1289_v51  ;;  %v1849_v11 = vld [vmem:[%s2392_s22] ss:$0 sm:$0xff] }
 0x64d   :  { %1883 = vrsqrt.f32 %v1291_v58  ;;  %vm1299_vm5 = vweird.f32 %v1291_v58 }
 0x653   :  { %v1884_v28 = vpop.eup %1883 }
 0x654   :  { %v1294_v46 = vmul.f32 %v1884_v28, %v1291_v58  ;;  %vm1300_vm12 = vweird.f32 %v1884_v28  ;;  %v1850_v58 = vld [vmem:[%s2397_s26] ss:$0 sm:$0xff] }
 0x655   :  { %vm1301_vm7 = vmor %vm1299_vm5, %vm1300_vm12 }
 0x656   :  { %v1295_v60 = vmul.f32 %v1884_v28, %v1294_v46 }
 0x658   :  { %v1296_v15 = vmul.f32 0.5, %v1295_v60 }
 0x65a   :  { %v1297_v35 = vsub.f32 1.5, %v1296_v15  ;;  %v1852_v15 = vld [vmem:[%s2429_s10] ss:$0 sm:$0xff] }
 0x65c   :  { %v1298_v41 = vmul.f32 %v1884_v28, %v1297_v35 }
 0x65e   :  { %v1302_v32 = vsel %vm1301_vm7, %v1884_v28, %v1298_v41 }
 0x65f   :  { %v1313_v48 = vmul.f32 %v1302_v32, %v2368_v61 }
 0x661   :  { %v1318_v52 = vmul.f32 %v1847_v22, %v1313_v48 }
 0x663   :  { %v1323_v36 = vadd.f32 %v1848_v59, %v1318_v52 }
 0x665   :  { %v1325_v57 = vmax.f32 %v1323_v36, 0.0 }
 0x6b6   :  { %v1448_v43 = vpop.xlane.xlu1 %1447 }
 0x6b7   :  { %v1453_v44 = vmul.f32 %v1448_v43, %v2364_v18 }
 0x6b9   :  { %v2404_v1 = vsub.f32 %v1442_v20, %v1453_v44 }
 0x6bb   :  { %v1457_v27 = vmul.f32 %v2404_v1, %v2404_v1 }
 0x6bd   :  { %v1459_v29 = vsel %vm565_vm13, %v1457_v27, 0.0 }
 0x6be   :  { %v1452_v33 = vpop.xlane.xlu0 %1451  ;;  %1460 = vadd.xlane.f32.xlu0 %v1459_v29  ;;  %v1288_v34 = vpop.xlane.xlu1 %1287  ;;  %v1851_v29 = vld [vmem:[%s2423_s4] ss:$0 sm:$0xff] }
 0x6bf   :  { %v1454_v42 = vmul.f32 %v1452_v33, %v2364_v18  ;;  %v1290_v14 = vmul.f32 %v1288_v34, %v2364_v18 }
 0x6c1   :  { %v2411_v37 = vsub.f32 %v1444_v56, %v1454_v42  ;;  %v1292_v38 = vadd.f32 1e-05, %v1290_v14 }
 0x6c3   :  { %1885 = vrsqrt.f32 %v1292_v38  ;;  %v1458_v62 = vmul.f32 %v2411_v37, %v2411_v37  ;;  %vm1309_vm0 = vweird.f32 %v1292_v38 }
 0x6c5   :  { %v1462_v9 = vsel %vm1449_vm4, %v1458_v62, 0.0 }
 0x6c6   :  { %1463 = vadd.xlane.f32.xlu2 %v1462_v9 }
 0x6c9   :  { %v1886_v3 = vpop.eup %1885 }
 0x6ca   :  { %v1304_v40 = vmul.f32 %v1886_v3, %v1292_v38  ;;  %vm1310_vm8 = vweird.f32 %v1886_v3 }
 0x6cb   :  { %vm1311_vm6 = vmor %vm1309_vm0, %vm1310_vm8 }
 0x6cc   :  { %v1305_v12 = vmul.f32 %v1886_v3, %v1304_v40 }
 0x6ce   :  { %v1306_v47 = vmul.f32 0.5, %v1305_v12 }
 0x6d0   :  { %v1307_v49 = vsub.f32 1.5, %v1306_v47 }
 0x6d2   :  { %v1308_v5 = vmul.f32 %v1886_v3, %v1307_v49 }
 0x6d4   :  { %v1312_v31 = vsel %vm1311_vm6, %v1886_v3, %v1308_v5 }
 0x6d5   :  { %v1314_v13 = vmul.f32 %v1312_v31, %v2382_v21 }
 0x6d7   :  { %v1319_v53 = vmul.f32 %v1847_v22, %v1314_v13 }
 0x6d9   :  { %v1324_v54 = vadd.f32 %v1848_v59, %v1319_v53 }
 0x6db   :  { %v1326_v45 = vmax.f32 %v1324_v54, 0.0 }
 0x6dd   :  { %v1327_v61 = vpack.c.bf16 %v1326_v45, %v1325_v57 }
 0x6df   :  { %1730 = vmatmul.msk.bf16.vlgmr.msra.gmra.mxu1 %vm565_vm13, %v1327_v61 }
 0x731   :  { %v1461_v63 = vpop.xlane.xlu0 %1460 }
 0x732   :  { %v1465_v30 = vmul.f32 %v1461_v63, %v2364_v18 }
 0x734   :  { %v1467_v16 = vadd.f32 1e-05, %v1465_v30 }
 0x736   :  { %1887 = vrsqrt.f32 %v1467_v16  ;;  %vm1475_vm14 = vweird.f32 %v1467_v16 }
 0x739   :  { %v1464_v7 = vpop.xlane.xlu2 %1463 }
 0x73a   :  { %v1466_v8 = vmul.f32 %v1464_v7, %v2364_v18 }
 0x73c   :  { %v1888_v6 = vpop.eup %1887  ;;  %v1468_v10 = vadd.f32 1e-05, %v1466_v8 }
 0x73d   :  { %v1470_v55 = vmul.f32 %v1888_v6, %v1467_v16  ;;  %vm1476_vm10 = vweird.f32 %v1888_v6 }
 0x73e   :  { %1889 = vrsqrt.f32 %v1468_v10  ;;  %vm1477_vm15 = vmor %vm1475_vm14, %vm1476_vm10  ;;  %vm1485_vm3 = vweird.f32 %v1468_v10 }
 0x73f   :  { %v1471_v17 = vmul.f32 %v1888_v6, %v1470_v55 }
 0x741   :  { %v1472_v19 = vmul.f32 0.5, %v1471_v17 }
 0x743   :  { %v1473_v20 = vsub.f32 1.5, %v1472_v19 }
 0x744   :  { %v1890_v21 = vpop.eup %1889 }
 0x745   :  { %v1474_v23 = vmul.f32 %v1888_v6, %v1473_v20  ;;  %v1480_v24 = vmul.f32 %v1890_v21, %v1468_v10  ;;  %vm1486_vm2 = vweird.f32 %v1890_v21 }
 0x746   :  { %vm1487_vm9 = vmor %vm1485_vm3, %vm1486_vm2 }
 0x747   :  { %v1478_v25 = vsel %vm1477_vm15, %v1888_v6, %v1474_v23  ;;  %v1481_v56 = vmul.f32 %v1890_v21, %v1480_v24 }
 0x748   :  { %v1489_v18 = vmul.f32 %v1478_v25, %v2404_v1 }
 0x749   :  { %v1482_v39 = vmul.f32 0.5, %v1481_v56 }
 0x74a   :  { %v1494_v28 = vmul.f32 %v1849_v11, %v1489_v18 }
 0x74b   :  { %v1483_v0 = vsub.f32 1.5, %v1482_v39 }
 0x74c   :  { %v1499_v46 = vadd.f32 %v1850_v58, %v1494_v28 }
 0x74d   :  { %v1484_v51 = vmul.f32 %v1890_v21, %v1483_v0 }
 0x74e   :  { %v1501_v27 = vmax.f32 %v1499_v46, 0.0 }
 0x74f   :  { %v1488_v43 = vsel %vm1487_vm9, %v1890_v21, %v1484_v51 }
 0x750   :  { %v1490_v44 = vmul.f32 %v1488_v43, %v2411_v37 }
 0x752   :  { %v1495_v50 = vmul.f32 %v1849_v11, %v1490_v44 }
 0x754   :  { %v1500_v26 = vadd.f32 %v1850_v58, %v1495_v50 }
 0x756   :  { %v1502_v60 = vmax.f32 %v1500_v26, 0.0 }
 0x758   :  { %v1503_v1 = vpack.c.bf16 %v1502_v60, %v1501_v27 }
 0x75a   :  { %1750 = vmatmul.msk.bf16.vlgmr.msra.gmra.mxu0 %vm565_vm13, %v1503_v1  ;;  %vm1537_vm13 = vcmask 27648  }
 0x75c   :  { %v1355_v33 = vpop.f32.mrf.mxu1 }
 0x75d   :  { %v1356_v34 = vadd.f32 %v1851_v29, %v1355_v33 }
 0x75f   :  { %1360 = vst.msk [vmem:[%s1595_s18] sm:$0xff] %vm239_vm1, %v1356_v34 }
 0x764   :  { %v1357_v42 = vpop.f32.mrf.mxu1 }
 0x765   :  { %v1358_v14 = vadd.f32 %v1851_v29, %v1357_v42 }
 0x767   :  { %1361 = vst.msk [vmem:[%s1595_s18 + $0x8] sm:$0xff] %vm239_vm1, %v1358_v14 }
 0x7d7   :  { %v1531_v37 = vpop.f32.mrf.mxu0 }
 0x7d8   :  { %v1532_v38 = vadd.f32 %v1852_v15, %v1531_v37 }
 0x7da   :  { %1536 = vst.msk [vmem:[%s1597_s21] sm:$0xff] %vm290_vm11, %v1532_v38 }
 0x7df   :  { %v1533_v62 = vpop.f32.mrf.mxu0 }
 0x7e0   :  { %v1534_v35 = vadd.f32 %v1852_v15, %v1533_v62 }
 0x7e2   :  { %1538 = vst.msk [vmem:[%s1597_s21 + $0x8] sm:$0xf] %vm1537_vm13, %v1534_v35 }

</bundles_post_ra>
